<compile_context>
chip_gen: v6e
topology: v6e:2x2x1
jax: 0.10.0
libtpu: 0.0.40
codegen_flags: <defaults>
</compile_context>

<pallas_src>
import functools

import jax
import jax.numpy as jnp
from jax import lax
from jax.experimental import pallas as pl
from jax.experimental.pallas import tpu as pltpu


# ---------------------------------------------------------------------------
# Pallas kernel: GRU recurrence over one (time_block, batch_block) tile.
# ---------------------------------------------------------------------------
def gru_block_kernel(emb_ref, w_ih_hbm, w_hh_hbm, bias_x_ref, b_hn_ref, out_ref,
                     w_ih_vmem, w_hh_vmem, h_scr, dma_sem):
    """GRU recurrence for one time block of one batch block.

    emb_ref   : (Tb, Bb, H)  bf16  embedded inputs (dropout = identity, eval mode)
    w_ih_hbm  : (H, 3H)      bf16  input->hidden weights, raw HBM ref (pl.ANY)
    w_hh_hbm  : (H, 3H)      bf16  hidden->hidden weights, raw HBM ref (pl.ANY)
    bias_x_ref: (1, 3H)      f32   b_ih with b_hh folded in for the r/z gates
    b_hn_ref  : (1, H)       f32   hidden bias of the n gate (stays inside r * (...))
    out_ref   : (Tb, Bb, H)  f32   per-step hidden outputs h_t
    w_*_vmem  : single-buffered VMEM copies of the weights (filled once)
    h_scr     : (Bb, H) f32  hidden state carried across time grid steps
    dma_sem   : (2,) DMA semaphores for the one-shot weight copies
    """
    t_step = pl.program_id(1)

    @pl.when(t_step == 0)
    def _():
        # Single-buffer the grid-invariant weights: one DMA per batch block per core
        # instead of a double-buffered stream on every grid step.
        cp_ih = pltpu.make_async_copy(w_ih_hbm, w_ih_vmem, dma_sem.at[0])
        cp_hh = pltpu.make_async_copy(w_hh_hbm, w_hh_vmem, dma_sem.at[1])
        cp_ih.start()
        cp_hh.start()
        cp_ih.wait()
        cp_hh.wait()
        h_scr[...] = jnp.zeros_like(h_scr)

    tb, _, H = out_ref.shape

    # Grid-invariant operands: load once, reuse across the unrolled time loop.
    w_ih = w_ih_vmem[...]            # (H, 3H) bf16
    w_hh = w_hh_vmem[...]            # (H, 3H) bf16
    bias_x = bias_x_ref[...]         # (1, 3H) f32, broadcasts over batch
    b_hn = b_hn_ref[...]             # (1, H)  f32

    def step(t, h):
        # Input projection (independent of h): one fused bf16 MXU matmul for all 3 gates.
        gx = jnp.dot(emb_ref[t], w_ih, preferred_element_type=jnp.float32) + bias_x
        # Recurrent projection (serial path): one fused bf16 MXU matmul; carry stays f32.
        gh = jnp.dot(h.astype(jnp.bfloat16), w_hh, preferred_element_type=jnp.float32)
        r = jax.nn.sigmoid(gx[:, :H] + gh[:, :H])
        z = jax.nn.sigmoid(gx[:, H:2 * H] + gh[:, H:2 * H])
        n = jnp.tanh(gx[:, 2 * H:] + r * (gh[:, 2 * H:] + b_hn))
        h_new = (1.0 - z) * n + z * h
        out_ref[t] = h_new.astype(out_ref.dtype)
        return h_new

    # Capped unroll: enough for the scheduler to overlap MXU / VPU / EUP work of adjacent
    # steps without exploding code size / vreg pressure for large time blocks.
    h_scr[...] = lax.fori_loop(0, tb, step, h_scr[...], unroll=4)


def choose_time_block(T, Bb, H, block_budget_bytes=16 * 1024 * 1024):
    """Pick a time block so the double-buffered streamed blocks stay within budget.

    16 MiB keeps the streamed working set comfortable on every generation (v7x has only
    64 MiB physical VMEM); raise toward 32-48 MiB on v5e/v6e if DMA shows up exposed.
    """
    per_step = Bb * H * (2 + 4) * 2          # bf16 emb in + f32 out, double buffered
    tb = max(1, block_budget_bytes // max(per_step, 1))
    tb = min(tb, T, 256)
    if tb >= 8:
        tb = (tb // 8) * 8
    return int(max(tb, 1))


# ---------------------------------------------------------------------------
# Forward pass wrapper (embedding gather + Pallas GRU recurrence).
# ---------------------------------------------------------------------------
@functools.partial(jax.jit, static_argnames=("time_block", "batch_block"))
def encoder_rnn_forward(tokens, params, *, time_block=None, batch_block=None):
    """tokens: (B, T) int32.  Returns (outputs (B, T, H) f32, hidden (1, B, H) f32)."""
    B, T = tokens.shape
    H = params["embed"].shape[1]

    # Embedding gathered time-major directly (no big (B,T,H)->(T,B,H) HBM transpose),
    # cast to bf16 so the dominant HBM stream into the kernel is half width.
    # TODO(synk): dropout is identity here (eval-mode semantics); PyTorch training-mode
    # dropout RNG cannot be reproduced bit-exactly.
    emb_t = jnp.take(params["embed"], tokens.T, axis=0).astype(jnp.bfloat16)  # (T, B, H)

    Bb = batch_block if batch_block is not None else min(B, 128)
    Bb = max(1, min(int(Bb), B))
    B_pad = ((B + Bb - 1) // Bb) * Bb
    tb = time_block if time_block is not None else choose_time_block(T, Bb, H)
    tb = max(1, min(int(tb), T))
    T_pad = ((T + tb - 1) // tb) * tb

    if T_pad != T or B_pad != B:
        # Padding sits at the end of the time/batch axes; padded steps/rows only produce
        # outputs that are sliced away below, so outputs[:T] and h at t = T-1 are exact.
        emb_t = jnp.pad(emb_t, ((0, T_pad - T), (0, B_pad - B), (0, 0)))

    # VMEM accounting: double-buffered streams + single-buffered weights + carry (+slack).
    vmem_est = (tb * Bb * H * (2 + 4)) * 2 + 2 * (H * 3 * H) * 2 + Bb * H * 4
    vmem_limit = int(min(max(vmem_est * 2 + (2 << 20), 32 << 20), 48 << 20))

    out_t = pl.pallas_call(
        gru_block_kernel,
        out_shape=jax.ShapeDtypeStruct((T_pad, B_pad, H), jnp.float32),
        grid_spec=pltpu.PrefetchScalarGridSpec(
            num_scalar_prefetch=0,
            grid=(B_pad // Bb, T_pad // tb),      # (batch blocks ∥, time blocks serial)
            in_specs=[
                pl.BlockSpec((tb, Bb, H), lambda b, i: (i, b, 0)),   # embedded block
                pl.BlockSpec(memory_space=pl.ANY),                   # W_ih (raw HBM)
                pl.BlockSpec(memory_space=pl.ANY),                   # W_hh (raw HBM)
                pl.BlockSpec((1, 3 * H), lambda b, i: (0, 0)),       # bias_x (tiny)
                pl.BlockSpec((1, H), lambda b, i: (0, 0)),           # b_hn   (tiny)
            ],
            out_specs=pl.BlockSpec((tb, Bb, H), lambda b, i: (i, b, 0)),
            scratch_shapes=[
                pltpu.VMEM((H, 3 * H), jnp.bfloat16),   # W_ih, single-buffered
                pltpu.VMEM((H, 3 * H), jnp.bfloat16),   # W_hh, single-buffered
                pltpu.VMEM((Bb, H), jnp.float32),       # hidden-state carry
                pltpu.SemaphoreType.DMA((2,)),
            ],
        ),
        compiler_params=pltpu.CompilerParams(
            dimension_semantics=("parallel", "arbitrary"),
            vmem_limit_bytes=vmem_limit,
        ),
    )(emb_t, params["w_ih"], params["w_hh"], params["bias_x"], params["b_hn"])

    outputs = jnp.transpose(out_t[:T, :B], (1, 0, 2))   # (B, T, H), batch_first
    hidden = out_t[T - 1:T, :B]                         # (1, B, H) == h_{T-1}
    return outputs, hidden


# ---------------------------------------------------------------------------
# Parameter handling (PyTorch layout -> kernel layout) and pure-JAX reference.
# ---------------------------------------------------------------------------
def init_torch_layout_params(key, input_size, hidden_size):
    """Deterministic init matching PyTorch parameter shapes (n_layers=1)."""
    k_emb, k_wih, k_whh, k_bih, k_bhh = jax.random.split(key, 5)
    H = hidden_size
    bound = 1.0 / jnp.sqrt(H)
    embed = jax.random.normal(k_emb, (input_size, H), jnp.float32)
    w_ih = jax.random.uniform(k_wih, (3 * H, H), jnp.float32, -bound, bound)
    w_hh = jax.random.uniform(k_whh, (3 * H, H), jnp.float32, -bound, bound)
    b_ih = jax.random.uniform(k_bih, (3 * H,), jnp.float32, -bound, bound)
    b_hh = jax.random.uniform(k_bhh, (3 * H,), jnp.float32, -bound, bound)
    return embed, w_ih, w_hh, b_ih, b_hh


def prepare_kernel_params(embed, w_ih, w_hh, b_ih, b_hh):
    """Convert PyTorch-layout GRU params to the kernel's fused (H, 3H) bf16 layout."""
    H = embed.shape[1]
    w_ih_cat = jnp.transpose(w_ih).astype(jnp.bfloat16)   # (H, 3H), gate cols r|z|n
    w_hh_cat = jnp.transpose(w_hh).astype(jnp.bfloat16)   # (H, 3H)
    b_ih_g = b_ih.reshape(3, H)
    b_hh_g = b_hh.reshape(3, H)
    # Fold the hidden bias into the input-side bias for the r and z gates; the n-gate
    # hidden bias must stay inside the r-gated term.
    bias_x = jnp.concatenate([b_ih_g[0] + b_hh_g[0],
                              b_ih_g[1] + b_hh_g[1],
                              b_ih_g[2]]).reshape(1, 3 * H).astype(jnp.float32)
    b_hn = b_hh_g[2].reshape(1, H).astype(jnp.float32)
    return {"embed": embed, "w_ih": w_ih_cat, "w_hh": w_hh_cat,
            "bias_x": bias_x, "b_hn": b_hn}


def gru_reference(emb_bth, w_ih, w_hh, b_ih, b_hh):
    """Pure-JAX f32 reference GRU (batch_first), PyTorch gate order r, z, n."""
    B, T, H = emb_bth.shape
    h0 = jnp.zeros((B, H), jnp.float32)

    def step(h, x_t):
        gi = x_t @ w_ih.T + b_ih
        gh = h @ w_hh.T + b_hh
        i_r, i_z, i_n = gi[:, :H], gi[:, H:2 * H], gi[:, 2 * H:]
        h_r, h_z, h_n = gh[:, :H], gh[:, H:2 * H], gh[:, 2 * H:]
        r = jax.nn.sigmoid(i_r + h_r)
        z = jax.nn.sigmoid(i_z + h_z)
        n = jnp.tanh(i_n + r * h_n)
        h_new = (1.0 - z) * n + z * h
        return h_new, h_new

    h_fin, outs = lax.scan(step, h0, jnp.transpose(emb_bth, (1, 0, 2)))
    return jnp.transpose(outs, (1, 0, 2)), h_fin[None]


if __name__ == "__main__":
    vocab = 20
    hidden = 128      # multiple of 128 -> lane-aligned gate slices, MXU-friendly
    B, T = 32, 10
    time_block = 4    # T=10, Tb=4 -> exercises the time carry across grid steps + padding
    batch_block = 16  # 2 batch blocks -> exercises the parallel batch axis + h re-init

    key = jax.random.PRNGKey(0)
    k_params, k_tok = jax.random.split(key)
    embed, w_ih, w_hh, b_ih, b_hh = init_torch_layout_params(k_params, vocab, hidden)
    params = prepare_kernel_params(embed, w_ih, w_hh, b_ih, b_hh)
    tokens = jax.random.randint(k_tok, (B, T), 0, vocab, dtype=jnp.int32)

    outputs, hidden_state = encoder_rnn_forward(
        tokens, params, time_block=time_block, batch_block=batch_block)
    outputs = jax.block_until_ready(outputs)
    hidden_state = jax.block_until_ready(hidden_state)

    # Sanity-check against a pure-JAX f32 GRU reference (PyTorch semantics).
    emb = jnp.take(embed, tokens, axis=0)
    ref_out, ref_hid = gru_reference(emb, w_ih, w_hh, b_ih, b_hh)
    assert outputs.shape == (B, T, hidden)
    assert hidden_state.shape == (1, B, hidden)
    # bf16 MXU path -> small numeric drift vs the f32 reference; tolerances loosened.
    assert jnp.allclose(outputs, ref_out, atol=5e-2, rtol=5e-2), \
        float(jnp.max(jnp.abs(outputs - ref_out)))
    assert jnp.allclose(hidden_state, ref_hid, atol=5e-2, rtol=5e-2), \
        float(jnp.max(jnp.abs(hidden_state - ref_hid)))

    print("KERNEL_OK")
</pallas_src>

<mosaic_0001>
module attributes {stable_mosaic.version = 11 : i64} {
  func.func @gru_block_kernel(%arg0: i32, %arg1: i32, %arg2: memref<4x16x128xbf16, #tpu.memory_space<vmem>>, %arg3: memref<128x384xbf16, #tpu.memory_space<any>>, %arg4: memref<128x384xbf16, #tpu.memory_space<any>>, %arg5: memref<1x384xf32, #tpu.memory_space<vmem>>, %arg6: memref<1x128xf32, #tpu.memory_space<vmem>>, %arg7: memref<4x16x128xf32, #tpu.memory_space<vmem>>, %arg8: memref<128x384xbf16, #tpu.memory_space<vmem>>, %arg9: memref<128x384xbf16, #tpu.memory_space<vmem>>, %arg10: memref<16x128xf32, #tpu.memory_space<vmem>>, %arg11: memref<2x!tpu.dma_semaphore, #tpu.memory_space<semaphore_mem>>) attributes {dimension_semantics = [#tpu.dimension_semantics<parallel>, #tpu.dimension_semantics<arbitrary>], iteration_bounds = array<i64: 2, 3>, scalar_prefetch = 0 : i64, scratch_operands = 4 : i64, tpu.core_type = #tpu.core_type<tc>, window_params = [{transform_indices = @transform_0, window_bounds = array<i64: 4, 16, 128>}, {}, {}, {pipeline_mode = #tpu.pipeline_mode<synchronous>, transform_indices = @transform_3, window_bounds = array<i64: 1, 384>}, {pipeline_mode = #tpu.pipeline_mode<synchronous>, transform_indices = @transform_4, window_bounds = array<i64: 1, 128>}, {transform_indices = @transform_5, window_bounds = array<i64: 4, 16, 128>}]} {
    %c0_i32 = arith.constant 0 : i32
    %0 = arith.cmpi eq, %arg1, %c0_i32 : i32
    %1 = arith.extui %0 : i1 to i32
    %c0_i32_0 = arith.constant 0 : i32
    %2 = arith.cmpi ne, %1, %c0_i32_0 : i32
    scf.if %2 {
      %c0_i32_48 = arith.constant 0 : i32
      %169 = tpu.memref_slice %arg11[%c0_i32_48] : memref<2x!tpu.dma_semaphore, #tpu.memory_space<semaphore_mem>> -> memref<1x!tpu.dma_semaphore, #tpu.memory_space<semaphore_mem>>
      %170 = tpu.memref_squeeze %169 : memref<1x!tpu.dma_semaphore, #tpu.memory_space<semaphore_mem>> -> memref<!tpu.dma_semaphore, #tpu.memory_space<semaphore_mem>>
      tpu.enqueue_dma source(%arg3 : memref<128x384xbf16, #tpu.memory_space<any>>) target(%arg8 : memref<128x384xbf16, #tpu.memory_space<vmem>>) target_semaphore(%170 : memref<!tpu.dma_semaphore, #tpu.memory_space<semaphore_mem>>)
      %c1_i32_49 = arith.constant 1 : i32
      %171 = tpu.memref_slice %arg11[%c1_i32_49] : memref<2x!tpu.dma_semaphore, #tpu.memory_space<semaphore_mem>> -> memref<1x!tpu.dma_semaphore, #tpu.memory_space<semaphore_mem>>
      %172 = tpu.memref_squeeze %171 : memref<1x!tpu.dma_semaphore, #tpu.memory_space<semaphore_mem>> -> memref<!tpu.dma_semaphore, #tpu.memory_space<semaphore_mem>>
      tpu.enqueue_dma source(%arg4 : memref<128x384xbf16, #tpu.memory_space<any>>) target(%arg9 : memref<128x384xbf16, #tpu.memory_space<vmem>>) target_semaphore(%172 : memref<!tpu.dma_semaphore, #tpu.memory_space<semaphore_mem>>)
      %c0_i32_50 = arith.constant 0 : i32
      %173 = tpu.memref_slice %arg11[%c0_i32_50] : memref<2x!tpu.dma_semaphore, #tpu.memory_space<semaphore_mem>> -> memref<1x!tpu.dma_semaphore, #tpu.memory_space<semaphore_mem>>
      %174 = tpu.memref_squeeze %173 : memref<1x!tpu.dma_semaphore, #tpu.memory_space<semaphore_mem>> -> memref<!tpu.dma_semaphore, #tpu.memory_space<semaphore_mem>>
      tpu.wait_dma2 semaphore(%174 : memref<!tpu.dma_semaphore, #tpu.memory_space<semaphore_mem>>) src(%arg3 : memref<128x384xbf16, #tpu.memory_space<any>>) dst(%arg8 : memref<128x384xbf16, #tpu.memory_space<vmem>>)
      %c1_i32_51 = arith.constant 1 : i32
      %175 = tpu.memref_slice %arg11[%c1_i32_51] : memref<2x!tpu.dma_semaphore, #tpu.memory_space<semaphore_mem>> -> memref<1x!tpu.dma_semaphore, #tpu.memory_space<semaphore_mem>>
      %176 = tpu.memref_squeeze %175 : memref<1x!tpu.dma_semaphore, #tpu.memory_space<semaphore_mem>> -> memref<!tpu.dma_semaphore, #tpu.memory_space<semaphore_mem>>
      tpu.wait_dma2 semaphore(%176 : memref<!tpu.dma_semaphore, #tpu.memory_space<semaphore_mem>>) src(%arg4 : memref<128x384xbf16, #tpu.memory_space<any>>) dst(%arg9 : memref<128x384xbf16, #tpu.memory_space<vmem>>)
      %cst_52 = arith.constant 0.000000e+00 : f32
      %177 = vector.broadcast %cst_52 : f32 to vector<16x128xf32>
      %c0_53 = arith.constant 0 : index
      %c0_54 = arith.constant 0 : index
      %178 = vector.load %arg10[%c0_53, %c0_54] : memref<16x128xf32, #tpu.memory_space<vmem>>, vector<16x128xf32>
      tpu.vector_store %arg10[%c0_53, %c0_54], %177 {strides = array<i32>} : memref<16x128xf32, #tpu.memory_space<vmem>>, vector<16x128xf32>,
    } else {
    }
    %c0 = arith.constant 0 : index
    %c0_1 = arith.constant 0 : index
    %3 = vector.load %arg8[%c0, %c0_1] : memref<128x384xbf16, #tpu.memory_space<vmem>>, vector<128x384xbf16>
    %c0_2 = arith.constant 0 : index
    %c0_3 = arith.constant 0 : index
    %4 = vector.load %arg9[%c0_2, %c0_3] : memref<128x384xbf16, #tpu.memory_space<vmem>>, vector<128x384xbf16>
    %c0_4 = arith.constant 0 : index
    %c0_5 = arith.constant 0 : index
    %5 = vector.load %arg5[%c0_4, %c0_5] : memref<1x384xf32, #tpu.memory_space<vmem>>, vector<1x384xf32>
    %c0_6 = arith.constant 0 : index
    %c0_7 = arith.constant 0 : index
    %6 = vector.load %arg6[%c0_6, %c0_7] : memref<1x128xf32, #tpu.memory_space<vmem>>, vector<1x128xf32>
    %c0_8 = arith.constant 0 : index
    %c0_9 = arith.constant 0 : index
    %7 = vector.load %arg10[%c0_8, %c0_9] : memref<16x128xf32, #tpu.memory_space<vmem>>, vector<16x128xf32>
    %c0_i32_10 = arith.constant 0 : i32
    %8 = arith.index_cast %c0_i32_10 : i32 to index
    %c0_11 = arith.constant 0 : index
    %c0_12 = arith.constant 0 : index
    %9 = vector.load %arg2[%8, %c0_11, %c0_12] : memref<4x16x128xbf16, #tpu.memory_space<vmem>>, vector<1x16x128xbf16>
    %10 = vector.shape_cast %9 : vector<1x16x128xbf16> to vector<16x128xbf16>
    %cst = arith.constant dense<0.000000e+00> : vector<16x384xf32>
    %11 = tpu.matmul %10, %3, %cst {dimension_numbers = #tpu.dot_dimension_numbers<[1], [0], [0], [1], [0, 0, 1, 1], [], []>} : vector<16x128xbf16>, vector<128x384xbf16>, vector<16x384xf32> -> vector<16x384xf32>
    %12 = vector.broadcast %5 : vector<1x384xf32> to vector<16x384xf32>
    %13 = arith.addf %11, %12 : vector<16x384xf32>
    %14 = arith.truncf %7 : vector<16x128xf32> to vector<16x128xbf16>
    %cst_13 = arith.constant dense<0.000000e+00> : vector<16x384xf32>
    %15 = tpu.matmul %14, %4, %cst_13 {dimension_numbers = #tpu.dot_dimension_numbers<[1], [0], [0], [1], [0, 0, 1, 1], [], []>} : vector<16x128xbf16>, vector<128x384xbf16>, vector<16x384xf32> -> vector<16x384xf32>
    %16 = vector.extract_strided_slice %13 {offsets = [0, 0], sizes = [16, 128], strides = [1, 1]} : vector<16x384xf32> to vector<16x128xf32>
    %17 = vector.extract_strided_slice %15 {offsets = [0, 0], sizes = [16, 128], strides = [1, 1]} : vector<16x384xf32> to vector<16x128xf32>
    %18 = arith.addf %16, %17 : vector<16x128xf32>
    %19 = arith.negf %18 : vector<16x128xf32>
    %20 = math.exp %19 : vector<16x128xf32>
    %cst_14 = arith.constant 1.000000e+00 : f32
    %21 = vector.broadcast %cst_14 : f32 to vector<16x128xf32>
    %22 = arith.addf %21, %20 : vector<16x128xf32>
    %23 = arith.divf %21, %22 : vector<16x128xf32>
    %24 = vector.extract_strided_slice %13 {offsets = [0, 128], sizes = [16, 128], strides = [1, 1]} : vector<16x384xf32> to vector<16x128xf32>
    %25 = vector.extract_strided_slice %15 {offsets = [0, 128], sizes = [16, 128], strides = [1, 1]} : vector<16x384xf32> to vector<16x128xf32>
    %26 = arith.addf %24, %25 : vector<16x128xf32>
    %27 = arith.negf %26 : vector<16x128xf32>
    %28 = math.exp %27 : vector<16x128xf32>
    %cst_15 = arith.constant 1.000000e+00 : f32
    %29 = vector.broadcast %cst_15 : f32 to vector<16x128xf32>
    %30 = arith.addf %29, %28 : vector<16x128xf32>
    %31 = arith.divf %29, %30 : vector<16x128xf32>
    %32 = vector.extract_strided_slice %13 {offsets = [0, 256], sizes = [16, 128], strides = [1, 1]} : vector<16x384xf32> to vector<16x128xf32>
    %33 = vector.extract_strided_slice %15 {offsets = [0, 256], sizes = [16, 128], strides = [1, 1]} : vector<16x384xf32> to vector<16x128xf32>
    %34 = vector.broadcast %6 : vector<1x128xf32> to vector<16x128xf32>
    %35 = arith.addf %33, %34 : vector<16x128xf32>
    %36 = arith.mulf %23, %35 : vector<16x128xf32>
    %37 = arith.addf %32, %36 : vector<16x128xf32>
    %38 = math.tanh %37 : vector<16x128xf32>
    %cst_16 = arith.constant 1.000000e+00 : f32
    %39 = vector.broadcast %cst_16 : f32 to vector<16x128xf32>
    %40 = arith.subf %39, %31 : vector<16x128xf32>
    %41 = arith.mulf %40, %38 : vector<16x128xf32>
    %42 = arith.mulf %31, %7 : vector<16x128xf32>
    %43 = arith.addf %41, %42 : vector<16x128xf32>
    %44 = arith.index_cast %c0_i32_10 : i32 to index
    %c0_17 = arith.constant 0 : index
    %c0_18 = arith.constant 0 : index
    %45 = vector.load %arg7[%44, %c0_17, %c0_18] : memref<4x16x128xf32, #tpu.memory_space<vmem>>, vector<1x16x128xf32>
    %46 = vector.shape_cast %45 : vector<1x16x128xf32> to vector<16x128xf32>
    %47 = vector.shape_cast %43 : vector<16x128xf32> to vector<1x16x128xf32>
    tpu.vector_store %arg7[%44, %c0_17, %c0_18], %47 {strides = array<i32>} : memref<4x16x128xf32, #tpu.memory_space<vmem>>, vector<1x16x128xf32>,
    %c1_i32 = arith.constant 1 : i32
    %48 = arith.index_cast %c1_i32 : i32 to index
    %c0_19 = arith.constant 0 : index
    %c0_20 = arith.constant 0 : index
    %49 = vector.load %arg2[%48, %c0_19, %c0_20] : memref<4x16x128xbf16, #tpu.memory_space<vmem>>, vector<1x16x128xbf16>
    %50 = vector.shape_cast %49 : vector<1x16x128xbf16> to vector<16x128xbf16>
    %cst_21 = arith.constant dense<0.000000e+00> : vector<16x384xf32>
    %51 = tpu.matmul %50, %3, %cst_21 {dimension_numbers = #tpu.dot_dimension_numbers<[1], [0], [0], [1], [0, 0, 1, 1], [], []>} : vector<16x128xbf16>, vector<128x384xbf16>, vector<16x384xf32> -> vector<16x384xf32>
    %52 = vector.broadcast %5 : vector<1x384xf32> to vector<16x384xf32>
    %53 = arith.addf %51, %52 : vector<16x384xf32>
    %54 = arith.truncf %43 : vector<16x128xf32> to vector<16x128xbf16>
    %cst_22 = arith.constant dense<0.000000e+00> : vector<16x384xf32>
    %55 = tpu.matmul %54, %4, %cst_22 {dimension_numbers = #tpu.dot_dimension_numbers<[1], [0], [0], [1], [0, 0, 1, 1], [], []>} : vector<16x128xbf16>, vector<128x384xbf16>, vector<16x384xf32> -> vector<16x384xf32>
    %56 = vector.extract_strided_slice %53 {offsets = [0, 0], sizes = [16, 128], strides = [1, 1]} : vector<16x384xf32> to vector<16x128xf32>
    %57 = vector.extract_strided_slice %55 {offsets = [0, 0], sizes = [16, 128], strides = [1, 1]} : vector<16x384xf32> to vector<16x128xf32>
    %58 = arith.addf %56, %57 : vector<16x128xf32>
    %59 = arith.negf %58 : vector<16x128xf32>
    %60 = math.exp %59 : vector<16x128xf32>
    %cst_23 = arith.constant 1.000000e+00 : f32
    %61 = vector.broadcast %cst_23 : f32 to vector<16x128xf32>
    %62 = arith.addf %61, %60 : vector<16x128xf32>
    %63 = arith.divf %61, %62 : vector<16x128xf32>
    %64 = vector.extract_strided_slice %53 {offsets = [0, 128], sizes = [16, 128], strides = [1, 1]} : vector<16x384xf32> to vector<16x128xf32>
    %65 = vector.extract_strided_slice %55 {offsets = [0, 128], sizes = [16, 128], strides = [1, 1]} : vector<16x384xf32> to vector<16x128xf32>
    %66 = arith.addf %64, %65 : vector<16x128xf32>
    %67 = arith.negf %66 : vector<16x128xf32>
    %68 = math.exp %67 : vector<16x128xf32>
    %cst_24 = arith.constant 1.000000e+00 : f32
    %69 = vector.broadcast %cst_24 : f32 to vector<16x128xf32>
    %70 = arith.addf %69, %68 : vector<16x128xf32>
    %71 = arith.divf %69, %70 : vector<16x128xf32>
    %72 = vector.extract_strided_slice %53 {offsets = [0, 256], sizes = [16, 128], strides = [1, 1]} : vector<16x384xf32> to vector<16x128xf32>
    %73 = vector.extract_strided_slice %55 {offsets = [0, 256], sizes = [16, 128], strides = [1, 1]} : vector<16x384xf32> to vector<16x128xf32>
    %74 = vector.broadcast %6 : vector<1x128xf32> to vector<16x128xf32>
    %75 = arith.addf %73, %74 : vector<16x128xf32>
    %76 = arith.mulf %63, %75 : vector<16x128xf32>
    %77 = arith.addf %72, %76 : vector<16x128xf32>
    %78 = math.tanh %77 : vector<16x128xf32>
    %cst_25 = arith.constant 1.000000e+00 : f32
    %79 = vector.broadcast %cst_25 : f32 to vector<16x128xf32>
    %80 = arith.subf %79, %71 : vector<16x128xf32>
    %81 = arith.mulf %80, %78 : vector<16x128xf32>
    %82 = arith.mulf %71, %43 : vector<16x128xf32>
    %83 = arith.addf %81, %82 : vector<16x128xf32>
    %84 = arith.index_cast %c1_i32 : i32 to index
    %c0_26 = arith.constant 0 : index
    %c0_27 = arith.constant 0 : index
    %85 = vector.load %arg7[%84, %c0_26, %c0_27] : memref<4x16x128xf32, #tpu.memory_space<vmem>>, vector<1x16x128xf32>
    %86 = vector.shape_cast %85 : vector<1x16x128xf32> to vector<16x128xf32>
    %87 = vector.shape_cast %83 : vector<16x128xf32> to vector<1x16x128xf32>
    tpu.vector_store %arg7[%84, %c0_26, %c0_27], %87 {strides = array<i32>} : memref<4x16x128xf32, #tpu.memory_space<vmem>>, vector<1x16x128xf32>,
    %c2_i32 = arith.constant 2 : i32
    %88 = arith.index_cast %c2_i32 : i32 to index
    %c0_28 = arith.constant 0 : index
    %c0_29 = arith.constant 0 : index
    %89 = vector.load %arg2[%88, %c0_28, %c0_29] : memref<4x16x128xbf16, #tpu.memory_space<vmem>>, vector<1x16x128xbf16>
    %90 = vector.shape_cast %89 : vector<1x16x128xbf16> to vector<16x128xbf16>
    %cst_30 = arith.constant dense<0.000000e+00> : vector<16x384xf32>
    %91 = tpu.matmul %90, %3, %cst_30 {dimension_numbers = #tpu.dot_dimension_numbers<[1], [0], [0], [1], [0, 0, 1, 1], [], []>} : vector<16x128xbf16>, vector<128x384xbf16>, vector<16x384xf32> -> vector<16x384xf32>
    %92 = vector.broadcast %5 : vector<1x384xf32> to vector<16x384xf32>
    %93 = arith.addf %91, %92 : vector<16x384xf32>
    %94 = arith.truncf %83 : vector<16x128xf32> to vector<16x128xbf16>
    %cst_31 = arith.constant dense<0.000000e+00> : vector<16x384xf32>
    %95 = tpu.matmul %94, %4, %cst_31 {dimension_numbers = #tpu.dot_dimension_numbers<[1], [0], [0], [1], [0, 0, 1, 1], [], []>} : vector<16x128xbf16>, vector<128x384xbf16>, vector<16x384xf32> -> vector<16x384xf32>
    %96 = vector.extract_strided_slice %93 {offsets = [0, 0], sizes = [16, 128], strides = [1, 1]} : vector<16x384xf32> to vector<16x128xf32>
    %97 = vector.extract_strided_slice %95 {offsets = [0, 0], sizes = [16, 128], strides = [1, 1]} : vector<16x384xf32> to vector<16x128xf32>
    %98 = arith.addf %96, %97 : vector<16x128xf32>
    %99 = arith.negf %98 : vector<16x128xf32>
    %100 = math.exp %99 : vector<16x128xf32>
    %cst_32 = arith.constant 1.000000e+00 : f32
    %101 = vector.broadcast %cst_32 : f32 to vector<16x128xf32>
    %102 = arith.addf %101, %100 : vector<16x128xf32>
    %103 = arith.divf %101, %102 : vector<16x128xf32>
    %104 = vector.extract_strided_slice %93 {offsets = [0, 128], sizes = [16, 128], strides = [1, 1]} : vector<16x384xf32> to vector<16x128xf32>
    %105 = vector.extract_strided_slice %95 {offsets = [0, 128], sizes = [16, 128], strides = [1, 1]} : vector<16x384xf32> to vector<16x128xf32>
    %106 = arith.addf %104, %105 : vector<16x128xf32>
    %107 = arith.negf %106 : vector<16x128xf32>
    %108 = math.exp %107 : vector<16x128xf32>
    %cst_33 = arith.constant 1.000000e+00 : f32
    %109 = vector.broadcast %cst_33 : f32 to vector<16x128xf32>
    %110 = arith.addf %109, %108 : vector<16x128xf32>
    %111 = arith.divf %109, %110 : vector<16x128xf32>
    %112 = vector.extract_strided_slice %93 {offsets = [0, 256], sizes = [16, 128], strides = [1, 1]} : vector<16x384xf32> to vector<16x128xf32>
    %113 = vector.extract_strided_slice %95 {offsets = [0, 256], sizes = [16, 128], strides = [1, 1]} : vector<16x384xf32> to vector<16x128xf32>
    %114 = vector.broadcast %6 : vector<1x128xf32> to vector<16x128xf32>
    %115 = arith.addf %113, %114 : vector<16x128xf32>
    %116 = arith.mulf %103, %115 : vector<16x128xf32>
    %117 = arith.addf %112, %116 : vector<16x128xf32>
    %118 = math.tanh %117 : vector<16x128xf32>
    %cst_34 = arith.constant 1.000000e+00 : f32
    %119 = vector.broadcast %cst_34 : f32 to vector<16x128xf32>
    %120 = arith.subf %119, %111 : vector<16x128xf32>
    %121 = arith.mulf %120, %118 : vector<16x128xf32>
    %122 = arith.mulf %111, %83 : vector<16x128xf32>
    %123 = arith.addf %121, %122 : vector<16x128xf32>
    %124 = arith.index_cast %c2_i32 : i32 to index
    %c0_35 = arith.constant 0 : index
    %c0_36 = arith.constant 0 : index
    %125 = vector.load %arg7[%124, %c0_35, %c0_36] : memref<4x16x128xf32, #tpu.memory_space<vmem>>, vector<1x16x128xf32>
    %126 = vector.shape_cast %125 : vector<1x16x128xf32> to vector<16x128xf32>
    %127 = vector.shape_cast %123 : vector<16x128xf32> to vector<1x16x128xf32>
    tpu.vector_store %arg7[%124, %c0_35, %c0_36], %127 {strides = array<i32>} : memref<4x16x128xf32, #tpu.memory_space<vmem>>, vector<1x16x128xf32>,
    %c3_i32 = arith.constant 3 : i32
    %128 = arith.index_cast %c3_i32 : i32 to index
    %c0_37 = arith.constant 0 : index
    %c0_38 = arith.constant 0 : index
    %129 = vector.load %arg2[%128, %c0_37, %c0_38] : memref<4x16x128xbf16, #tpu.memory_space<vmem>>, vector<1x16x128xbf16>
    %130 = vector.shape_cast %129 : vector<1x16x128xbf16> to vector<16x128xbf16>
    %cst_39 = arith.constant dense<0.000000e+00> : vector<16x384xf32>
    %131 = tpu.matmul %130, %3, %cst_39 {dimension_numbers = #tpu.dot_dimension_numbers<[1], [0], [0], [1], [0, 0, 1, 1], [], []>} : vector<16x128xbf16>, vector<128x384xbf16>, vector<16x384xf32> -> vector<16x384xf32>
    %132 = vector.broadcast %5 : vector<1x384xf32> to vector<16x384xf32>
    %133 = arith.addf %131, %132 : vector<16x384xf32>
    %134 = arith.truncf %123 : vector<16x128xf32> to vector<16x128xbf16>
    %cst_40 = arith.constant dense<0.000000e+00> : vector<16x384xf32>
    %135 = tpu.matmul %134, %4, %cst_40 {dimension_numbers = #tpu.dot_dimension_numbers<[1], [0], [0], [1], [0, 0, 1, 1], [], []>} : vector<16x128xbf16>, vector<128x384xbf16>, vector<16x384xf32> -> vector<16x384xf32>
    %136 = vector.extract_strided_slice %133 {offsets = [0, 0], sizes = [16, 128], strides = [1, 1]} : vector<16x384xf32> to vector<16x128xf32>
    %137 = vector.extract_strided_slice %135 {offsets = [0, 0], sizes = [16, 128], strides = [1, 1]} : vector<16x384xf32> to vector<16x128xf32>
    %138 = arith.addf %136, %137 : vector<16x128xf32>
    %139 = arith.negf %138 : vector<16x128xf32>
    %140 = math.exp %139 : vector<16x128xf32>
    %cst_41 = arith.constant 1.000000e+00 : f32
    %141 = vector.broadcast %cst_41 : f32 to vector<16x128xf32>
    %142 = arith.addf %141, %140 : vector<16x128xf32>
    %143 = arith.divf %141, %142 : vector<16x128xf32>
    %144 = vector.extract_strided_slice %133 {offsets = [0, 128], sizes = [16, 128], strides = [1, 1]} : vector<16x384xf32> to vector<16x128xf32>
    %145 = vector.extract_strided_slice %135 {offsets = [0, 128], sizes = [16, 128], strides = [1, 1]} : vector<16x384xf32> to vector<16x128xf32>
    %146 = arith.addf %144, %145 : vector<16x128xf32>
    %147 = arith.negf %146 : vector<16x128xf32>
    %148 = math.exp %147 : vector<16x128xf32>
    %cst_42 = arith.constant 1.000000e+00 : f32
    %149 = vector.broadcast %cst_42 : f32 to vector<16x128xf32>
    %150 = arith.addf %149, %148 : vector<16x128xf32>
    %151 = arith.divf %149, %150 : vector<16x128xf32>
    %152 = vector.extract_strided_slice %133 {offsets = [0, 256], sizes = [16, 128], strides = [1, 1]} : vector<16x384xf32> to vector<16x128xf32>
    %153 = vector.extract_strided_slice %135 {offsets = [0, 256], sizes = [16, 128], strides = [1, 1]} : vector<16x384xf32> to vector<16x128xf32>
    %154 = vector.broadcast %6 : vector<1x128xf32> to vector<16x128xf32>
    %155 = arith.addf %153, %154 : vector<16x128xf32>
    %156 = arith.mulf %143, %155 : vector<16x128xf32>
    %157 = arith.addf %152, %156 : vector<16x128xf32>
    %158 = math.tanh %157 : vector<16x128xf32>
    %cst_43 = arith.constant 1.000000e+00 : f32
    %159 = vector.broadcast %cst_43 : f32 to vector<16x128xf32>
    %160 = arith.subf %159, %151 : vector<16x128xf32>
    %161 = arith.mulf %160, %158 : vector<16x128xf32>
    %162 = arith.mulf %151, %123 : vector<16x128xf32>
    %163 = arith.addf %161, %162 : vector<16x128xf32>
    %164 = arith.index_cast %c3_i32 : i32 to index
    %c0_44 = arith.constant 0 : index
    %c0_45 = arith.constant 0 : index
    %165 = vector.load %arg7[%164, %c0_44, %c0_45] : memref<4x16x128xf32, #tpu.memory_space<vmem>>, vector<1x16x128xf32>
    %166 = vector.shape_cast %165 : vector<1x16x128xf32> to vector<16x128xf32>
    %167 = vector.shape_cast %163 : vector<16x128xf32> to vector<1x16x128xf32>
    tpu.vector_store %arg7[%164, %c0_44, %c0_45], %167 {strides = array<i32>} : memref<4x16x128xf32, #tpu.memory_space<vmem>>, vector<1x16x128xf32>,
    %c4_i32 = arith.constant 4 : i32
    %c0_46 = arith.constant 0 : index
    %c0_47 = arith.constant 0 : index
    %168 = vector.load %arg10[%c0_46, %c0_47] : memref<16x128xf32, #tpu.memory_space<vmem>>, vector<16x128xf32>
    tpu.vector_store %arg10[%c0_46, %c0_47], %163 {strides = array<i32>} : memref<16x128xf32, #tpu.memory_space<vmem>>, vector<16x128xf32>,
    return
  }
  func.func @transform_0(%arg0: i32, %arg1: i32) -> (i32, i32, i32) {
    %c0_i32 = arith.constant 0 : i32
    %c0_i32_0 = arith.constant 0 : i32
    return %arg1, %arg0, %c0_i32 : i32, i32, i32
  }
  func.func @transform_3(%arg0: i32, %arg1: i32) -> (i32, i32) {
    %c0_i32 = arith.constant 0 : i32
    %c0_i32_0 = arith.constant 0 : i32
    %c0_i32_1 = arith.constant 0 : i32
    return %c0_i32, %c0_i32_0 : i32, i32
  }
  func.func @transform_4(%arg0: i32, %arg1: i32) -> (i32, i32) {
    %c0_i32 = arith.constant 0 : i32
    %c0_i32_0 = arith.constant 0 : i32
    %c0_i32_1 = arith.constant 0 : i32
    return %c0_i32, %c0_i32_0 : i32, i32
  }
  func.func @transform_5(%arg0: i32, %arg1: i32) -> (i32, i32, i32) {
    %c0_i32 = arith.constant 0 : i32
    %c0_i32_0 = arith.constant 0 : i32
    return %arg1, %arg0, %c0_i32 : i32, i32, i32
  }
}

</mosaic_0001>

<bundles_post_ra>
// kernel: encoder_rnn_forward.1
= control target key start
LH: loop header
LB: loop body
LE: loop exit
PB: predicated region body
PF: predicated region fallthrough
CT: control target
= control target key end

     0   :  { %s2516_s18 = smov 0   ;;  %s2518_s19 = smov 0   ;;  %s3253_s0 = inlined_call_operand.vmem [shape: bf16[12,32,128], index: 0, kind: input, shape index: {}]   ;;  %s3254_s1 = inlined_call_operand.vmem [shape: bf16[128,384], index: 1, kind: input, shape index: {}]   ;;  %s3255_s2 = inlined_call_operand.vmem [shape: bf16[128,384], index: 2, kind: input, shape index: {}]   ;;  %s3256_s3 = inlined_call_operand.vmem [shape: f32[1,384], index: 3, kind: input, shape index: {}]   ;;  %s3257_s4 = inlined_call_operand.vmem [shape: f32[1,128], index: 4, kind: input, shape index: {}]   ;;  %s3258_s5 = inlined_call_operand.vmem [shape: f32[12,32,128], index: 5, kind: output, shape index: {}]  }
   0x1   :  { %s2520_s20 = smov 0   ;;  %s2522_s21 = smov 0  }
   0x2   :  { %s2524_s22 = smov 0   ;;  %s2526_s23 = smov 0  }
   0x3   :  { %s2528_s24 = smov 0  }
   0x4 LB: > { %s24_s25 = sadd.s32 1, %s2472_s22  ;;  %s27_s26 = sadd.s32 1, %s2476_s23  ;;  %s2480_s24 = sphi %s2528_s24, %s15_s24   ;;  %s2476_s23 = sphi %s2526_s23, %s3344_s23   ;;  %s2472_s22 = sphi %s2524_s22, %s3343_s22   ;;  %s2468_s21 = sphi %s2522_s21, %s3342_s21   ;;  %s2464_s20 = sphi %s2520_s20, %s3341_s20   ;;  %s2460_s19 = sphi %s2518_s19, %s3340_s19   ;;  %s2456_s18 = sphi %s2516_s18, %s3339_s18  }
   0x5   : > { %p25_p0 = scmp.ge.s32.totalorder %s24_s25, 3  ;;  %s1877_s27 = sadd.s32 4294967295, %s2480_s24  }
   0x6   : > { %p43_p1 = scmp.ne.s32.totalorder %s2460_s19, %s2456_s18  ;;  %p44_p2 = scmp.eq.s32.totalorder %s2480_s24, 0 }
   0x7   : > { %s3346_s25 = smov (%p25_p0, %s24_s25), 0  ;;  %s3348_s26 = smov (!%p25_p0, %s27_s26), %s2476_s23 }
   0x8   : > { %p29_p3 = scmp.ge.s32.totalorder %s3348_s26, 2  ;;  %p117_p4 = scmp.eq.s32.totalorder %s1877_s27, 5 }
   0x9   : > { %s31_s28 = ssub.s32 %s2472_s22, %s3346_s25  ;;  %p45_p5 = por %p44_p2, %p43_p1 }
   0xa   : > { %s3350_s26 = smov (%p29_p3, %s3348_s26), 0  ;;  %p2564_p6 = por %p117_p4, %p43_p1 }
   0xb   : > { %s32_s30 = ssub.s32 %s2476_s23, %s3350_s26  ;;  %s36_s7 = sadd.s32 1, %s2460_s19 }
   0xc   : > { %s33_s6 = sor.u32 %s32_s30, %s31_s28  ;;  %p1880_p8 = scmp.ge.s32.totalorder %s2480_s24, 6 }
   0xd   : > { %p34_p7 = scmp.eq.s32.totalorder %s33_s6, 0 }
   0xe   : > { %145 = sbr.rel (%p1880_p8) target bundleno = 28 (0x1c), region = 24 }
   0xf   : > { %s2572_s8 = scalar_select %p34_p7, %s2460_s19, %s36_s7  }
  0x13   : > { %148 = sbr.rel (!%p45_p5) target bundleno = 28 (0x1c), region = 28  ;;  %s150_s9 = sand.u32 (%p45_p5), 1, %s2460_s19  }
  0x14   : > { %s1883_s10 = sshll.u32 (%p45_p5), %s2476_s23, 1  ;;  %s1881_s11 = sshll.u32 (%p45_p5), %s150_s9, 5 }
  0x15   : > { %s1980_s12 = sshll.u32 (%p45_p5), %s2472_s22, 4  ;;  %s152_s27 = scalar_lea.vmem (%p45_p5), [#allocation6], %s1881_s11 }
  0x16   : > { %s156_s13 = sadd.s32 (%p45_p5), %s1980_s12, %s1883_s10 }
  0x17   : > { %s1885_s14 = sshll.u32 (%p45_p5), %s156_s13, 2 }
  0x18   : > { %s158_s17 = scalar_lea.vmem %s3253_s0, %s1885_s14 }
  0x19   : > { %v175_v0 = vld [vmem:[%s158_s17] sm:$0xff]   ;;  %v179_v1 = vld [vmem:[%s158_s17 + $0x10] sm:$0xff]  }
  0x1a   : > { %v183_v2 = vld [vmem:[%s158_s17 + $0x20] sm:$0xff]   ;;  %176 = vst [vmem:[%s152_s27] sm:$0xff] %v175_v0   ;;  %180 = vst [vmem:[%s152_s27 + $0x8] sm:$0xff] %v179_v1   ;;  %v187_v3 = vld [vmem:[%s158_s17 + $0x30] sm:$0xff]  }
  0x1b   : > { %184 = vst [vmem:[%s152_s27 + $0x10] sm:$0xff] %v183_v2   ;;  %188 = vst [vmem:[%s152_s27 + $0x18] sm:$0xff] %v187_v3  }
  0x1c PF: > { %p1886_p9 = scmp.ge.s32.totalorder %s2480_s24, 1  ;;  %p229_p10 = scmp.lt.s32.totalorder %s2480_s24, 7 }
  0x1e   : > { %p230_p11 = pnand %p1886_p9, %p229_p10 }
  0x20   : > { %233 = sbr.rel (%p230_p11) target bundleno = 1170 (0x492), region = 69 }
  0x25   : > { %s236_s28 = sand.u32 1, %s2456_s18   ;;  %p1889_p12 = scmp.ne.s32.totalorder %s2464_s20, 0 }
  0x26   : > { %s1887_s30 = sshll.u32 %s236_s28, 5  ;;  %s1888_s6 = sshll.u32 %s236_s28, 6 }
  0x27   : > { %s2584_s7 = scalar_lea.vmem [#allocation6], %s1887_s30  ;;  %s2586_s9 = scalar_lea.vmem [#allocation7], %s1888_s6 }
  0x28   : > { %266 = sbr.rel (%p1889_p12) target bundleno = 77 (0x4d), region = 77 }
  0x2d   : > { %v300_v4 = vld [vmem:[%s3254_s1] sm:$0xff]  ;;  %v302_v5 = vld [vmem:[%s3254_s1 + $0x8] sm:$0xff]  ;;  %v304_v6 = vld [vmem:[%s3254_s1 + $0x10] sm:$0xff] }
  0x2e   : > { %301 = vst [vmem:[#allocation2] sm:$0xff] %v300_v4  ;;  %303 = vst [vmem:[#allocation2 + $0x8] sm:$0xff] %v302_v5  ;;  %v306_v7 = vld [vmem:[%s3254_s1 + $0x18] sm:$0xff]  ;;  %v308_v8 = vld [vmem:[%s3254_s1 + $0x20] sm:$0xff] }
  0x2f   : > { %305 = vst [vmem:[#allocation2 + $0x10] sm:$0xff] %v304_v6  ;;  %v310_v9 = vld [vmem:[%s3254_s1 + $0x28] sm:$0xff]  ;;  %307 = vst [vmem:[#allocation2 + $0x18] sm:$0xff] %v306_v7  ;;  %v312_v10 = vld [vmem:[%s3254_s1 + $0x30] sm:$0xff] }
  0x30   : > { %309 = vst [vmem:[#allocation2 + $0x20] sm:$0xff] %v308_v8  ;;  %311 = vst [vmem:[#allocation2 + $0x28] sm:$0xff] %v310_v9  ;;  %v314_v11 = vld [vmem:[%s3254_s1 + $0x38] sm:$0xff]  ;;  %v316_v12 = vld [vmem:[%s3254_s1 + $0x40] sm:$0xff] }
  0x31   : > { %313 = vst [vmem:[#allocation2 + $0x30] sm:$0xff] %v312_v10  ;;  %315 = vst [vmem:[#allocation2 + $0x38] sm:$0xff] %v314_v11  ;;  %v318_v13 = vld [vmem:[%s3254_s1 + $0x48] sm:$0xff]  ;;  %v320_v14 = vld [vmem:[%s3254_s1 + $0x50] sm:$0xff] }
  0x32   : > { %317 = vst [vmem:[#allocation2 + $0x40] sm:$0xff] %v316_v12  ;;  %v322_v15 = vld [vmem:[%s3254_s1 + $0x58] sm:$0xff]  ;;  %319 = vst [vmem:[#allocation2 + $0x48] sm:$0xff] %v318_v13  ;;  %v324_v16 = vld [vmem:[%s3254_s1 + $0x60] sm:$0xff] }
  0x33   : > { %321 = vst [vmem:[#allocation2 + $0x50] sm:$0xff] %v320_v14  ;;  %323 = vst [vmem:[#allocation2 + $0x58] sm:$0xff] %v322_v15  ;;  %v326_v17 = vld [vmem:[%s3254_s1 + $0x68] sm:$0xff]  ;;  %v328_v18 = vld [vmem:[%s3254_s1 + $0x70] sm:$0xff] }
  0x34   : > { %325 = vst [vmem:[#allocation2 + $0x60] sm:$0xff] %v324_v16  ;;  %327 = vst [vmem:[#allocation2 + $0x68] sm:$0xff] %v326_v17  ;;  %v330_v19 = vld [vmem:[%s3254_s1 + $0x78] sm:$0xff]  ;;  %v332_v20 = vld [vmem:[%s3254_s1 + $0x80] sm:$0xff] }
  0x35   : > { %329 = vst [vmem:[#allocation2 + $0x70] sm:$0xff] %v328_v18  ;;  %v334_v21 = vld [vmem:[%s3254_s1 + $0x88] sm:$0xff]  ;;  %331 = vst [vmem:[#allocation2 + $0x78] sm:$0xff] %v330_v19  ;;  %v336_v22 = vld [vmem:[%s3254_s1 + $0x90] sm:$0xff] }
  0x36   : > { %333 = vst [vmem:[#allocation2 + $0x80] sm:$0xff] %v332_v20  ;;  %335 = vst [vmem:[#allocation2 + $0x88] sm:$0xff] %v334_v21  ;;  %v338_v23 = vld [vmem:[%s3254_s1 + $0x98] sm:$0xff]  ;;  %v340_v24 = vld [vmem:[%s3254_s1 + $0xa0] sm:$0xff] }
  0x37   : > { %337 = vst [vmem:[#allocation2 + $0x90] sm:$0xff] %v336_v22  ;;  %339 = vst [vmem:[#allocation2 + $0x98] sm:$0xff] %v338_v23  ;;  %v342_v25 = vld [vmem:[%s3254_s1 + $0xa8] sm:$0xff]  ;;  %v344_v26 = vld [vmem:[%s3254_s1 + $0xb0] sm:$0xff] }
  0x38   : > { %341 = vst [vmem:[#allocation2 + $0xa0] sm:$0xff] %v340_v24  ;;  %v346_v27 = vld [vmem:[%s3254_s1 + $0xb8] sm:$0xff]  ;;  %343 = vst [vmem:[#allocation2 + $0xa8] sm:$0xff] %v342_v25 }
  0x39   : > { %345 = vst [vmem:[#allocation2 + $0xb0] sm:$0xff] %v344_v26  ;;  %347 = vst [vmem:[#allocation2 + $0xb8] sm:$0xff] %v346_v27 }
  0x3a   : > { %355 = vsyncadd [#allocation5], 3072  ;;  %v390_v28 = vld [vmem:[%s3255_s2] sm:$0xff]  ;;  %v392_v29 = vld [vmem:[%s3255_s2 + $0x8] sm:$0xff] }
  0x3b   : > { %391 = vst [vmem:[#allocation3] sm:$0xff] %v390_v28  ;;  %393 = vst [vmem:[#allocation3 + $0x8] sm:$0xff] %v392_v29  ;;  %v394_v30 = vld [vmem:[%s3255_s2 + $0x10] sm:$0xff]  ;;  %v396_v31 = vld [vmem:[%s3255_s2 + $0x18] sm:$0xff] }
  0x3c   : > { %v398_v32 = vld [vmem:[%s3255_s2 + $0x20] sm:$0xff]  ;;  %395 = vst [vmem:[#allocation3 + $0x10] sm:$0xff] %v394_v30  ;;  %397 = vst [vmem:[#allocation3 + $0x18] sm:$0xff] %v396_v31  ;;  %v400_v33 = vld [vmem:[%s3255_s2 + $0x28] sm:$0xff] }
  0x3d   : > { %399 = vst [vmem:[#allocation3 + $0x20] sm:$0xff] %v398_v32  ;;  %v402_v34 = vld [vmem:[%s3255_s2 + $0x30] sm:$0xff]  ;;  %v404_v35 = vld [vmem:[%s3255_s2 + $0x38] sm:$0xff]  ;;  %401 = vst [vmem:[#allocation3 + $0x28] sm:$0xff] %v400_v33 }
  0x3e   : > { %403 = vst [vmem:[#allocation3 + $0x30] sm:$0xff] %v402_v34  ;;  %405 = vst [vmem:[#allocation3 + $0x38] sm:$0xff] %v404_v35  ;;  %v406_v36 = vld [vmem:[%s3255_s2 + $0x40] sm:$0xff]  ;;  %v408_v37 = vld [vmem:[%s3255_s2 + $0x48] sm:$0xff] }
  0x3f   : > { %v410_v38 = vld [vmem:[%s3255_s2 + $0x50] sm:$0xff]  ;;  %407 = vst [vmem:[#allocation3 + $0x40] sm:$0xff] %v406_v36  ;;  %409 = vst [vmem:[#allocation3 + $0x48] sm:$0xff] %v408_v37  ;;  %v412_v39 = vld [vmem:[%s3255_s2 + $0x58] sm:$0xff] }
  0x40   : > { %411 = vst [vmem:[#allocation3 + $0x50] sm:$0xff] %v410_v38  ;;  %v414_v40 = vld [vmem:[%s3255_s2 + $0x60] sm:$0xff]  ;;  %v416_v41 = vld [vmem:[%s3255_s2 + $0x68] sm:$0xff]  ;;  %413 = vst [vmem:[#allocation3 + $0x58] sm:$0xff] %v412_v39 }
  0x41   : > { %415 = vst [vmem:[#allocation3 + $0x60] sm:$0xff] %v414_v40  ;;  %417 = vst [vmem:[#allocation3 + $0x68] sm:$0xff] %v416_v41  ;;  %v418_v42 = vld [vmem:[%s3255_s2 + $0x70] sm:$0xff]  ;;  %v420_v43 = vld [vmem:[%s3255_s2 + $0x78] sm:$0xff] }
  0x42   : > { %v422_v44 = vld [vmem:[%s3255_s2 + $0x80] sm:$0xff]  ;;  %419 = vst [vmem:[#allocation3 + $0x70] sm:$0xff] %v418_v42  ;;  %421 = vst [vmem:[#allocation3 + $0x78] sm:$0xff] %v420_v43  ;;  %v424_v45 = vld [vmem:[%s3255_s2 + $0x88] sm:$0xff] }
  0x43   : > { %423 = vst [vmem:[#allocation3 + $0x80] sm:$0xff] %v422_v44  ;;  %v426_v46 = vld [vmem:[%s3255_s2 + $0x90] sm:$0xff]  ;;  %v428_v47 = vld [vmem:[%s3255_s2 + $0x98] sm:$0xff]  ;;  %425 = vst [vmem:[#allocation3 + $0x88] sm:$0xff] %v424_v45 }
  0x44   : > { %427 = vst [vmem:[#allocation3 + $0x90] sm:$0xff] %v426_v46  ;;  %429 = vst [vmem:[#allocation3 + $0x98] sm:$0xff] %v428_v47  ;;  %v430_v48 = vld [vmem:[%s3255_s2 + $0xa0] sm:$0xff]  ;;  %v432_v49 = vld [vmem:[%s3255_s2 + $0xa8] sm:$0xff] }
  0x45   : > { %v434_v50 = vld [vmem:[%s3255_s2 + $0xb0] sm:$0xff]  ;;  %431 = vst [vmem:[#allocation3 + $0xa0] sm:$0xff] %v430_v48  ;;  %433 = vst [vmem:[#allocation3 + $0xa8] sm:$0xff] %v432_v49  ;;  %v436_v51 = vld [vmem:[%s3255_s2 + $0xb8] sm:$0xff] }
  0x46   : > { %435 = vst [vmem:[#allocation3 + $0xb0] sm:$0xff] %v434_v50  ;;  %437 = vst [vmem:[#allocation3 + $0xb8] sm:$0xff] %v436_v51 }
  0x47   : > { %445 = vsyncadd [#allocation5 + $0x1], 3072 }
  0x48   : > { %2450 = dma.done.wait [#allocation5], 3072 }
  0x49   : > { %2451 = vsyncadd [#allocation5], 4294964224 }
  0x4a   : > { %2452 = dma.done.wait [#allocation5 + $0x1], 3072 }
  0x4b   : > { %2453 = vsyncadd [#allocation5 + $0x1], 4294964224  ;;  %v2482_v52 = vmov 0.0  }
  0x4c   : > { %452 = vst [vmem:[#allocation4] sm:$0xff] %v2482_v52  ;;  %453 = vst [vmem:[#allocation4 + $0x8] sm:$0xff] %v2482_v52 }
  0x4d PF: > { %v2733_v53 = vld [vmem:[#allocation2 + $0xac] ss:$12 sps:$4 sm:$0xff]   ;;  %v2735_v54 = vld [vmem:[#allocation2 + $0xa8] ss:$12 sps:$4 sm:$0xff]   ;;  %v3262_v55 = vmov 0.0   ;;  %v3259_v56 = vmov 0   ;;  %v525_v47 = vlaneseq }
  0x4e   : > { %3293 = vst [vmem:[#allocation12_spill] sm:$0xff] %v2733_v53  ;;  %2054 = vmatprep.subr.bf16.mxu1 %v3262_v55  ;;  %706 = vmatprep.mubr.bf16.mxu0 %v3259_v56  ;;  %v2740_v57 = vld [vmem:[#allocation2 + $0x94] ss:$12 sps:$4 sm:$0xff]   ;;  %vm2485_vm0 = vmmov 0   ;;  %v2745_v58 = vld [vmem:[#allocation2 + $0x90] ss:$12 sps:$4 sm:$0xff]  }
  0x4f   : > { %674 = vmatprep.subr.bf16.mxu0 %v2733_v53  ;;  %2070 = vmatprep.mubr.msk.bf16.mxu1 %vm2485_vm0, %v3262_v55  ;;  %v2748_v59 = vld [vmem:[#allocation2 + $0x7c] ss:$12 sps:$4 sm:$0xff]   ;;  %v2751_v60 = vld [vmem:[#allocation2 + $0x78] ss:$12 sps:$4 sm:$0xff]   ;;  %v2759_v63 = vld [vmem:[#allocation2 + $0x60] ss:$12 sps:$4 sm:$0xff]  }
  0x50   : > { %675 = vmatpush1.bf16.msra.mxu0 %v2735_v54  ;;  %v2754_v61 = vld [vmem:[#allocation2 + $0x64] ss:$12 sps:$4 sm:$0xff]   ;;  %v2761_v0 = vld [vmem:[#allocation2 + $0x4c] ss:$12 sps:$4 sm:$0xff]   ;;  %v2768_v2 = vld [vmem:[#allocation2 + $0x48] ss:$12 sps:$4 sm:$0xff]  }
  0x51   : > { %676 = vmatprep.subr.bf16.mxu0 %v2740_v57  ;;  %v2756_v62 = vld [vmem:[#allocation2 + $0xb0] ss:$12 sps:$4 sm:$0xff]   ;;  %v2765_v1 = vld [vmem:[#allocation2 + $0x98] ss:$12 sps:$4 sm:$0xff]   ;;  %v2771_v3 = vld [vmem:[#allocation2 + $0x34] ss:$12 sps:$4 sm:$0xff]  }
  0x52   : > { %2055 = vmatpush3.bf16.msra.mxu1 %v2756_v62  ;;  %v2775_v4 = vld [vmem:[#allocation2 + $0x80] ss:$12 sps:$4 sm:$0xff]   ;;  %v2779_v5 = vld [vmem:[#allocation2 + $0x30] ss:$12 sps:$4 sm:$0xff]   ;;  %v2785_v7 = vld [vmem:[#allocation2 + $0x68] ss:$12 sps:$4 sm:$0xff]  }
  0x53   : > { %2056 = vmatprep.subr.bf16.mxu1 %v3262_v55  ;;  %v2781_v6 = vld [vmem:[#allocation2 + $0x1c] ss:$12 sps:$4 sm:$0xff]   ;;  %v2788_v8 = vld [vmem:[#allocation2 + $0x18] ss:$12 sps:$4 sm:$0xff]   ;;  %v2799_v11 = vld [vmem:[#allocation2] ss:$12 sps:$4 sm:$0xff]  }
  0x54   : > { %677 = vmatpush1.bf16.msra.mxu0 %v2745_v58  ;;  %v2791_v9 = vld [vmem:[#allocation2 + $0x4] ss:$12 sps:$4 sm:$0xff]   ;;  %v2802_v12 = vld [vmem:[#allocation3 + $0xac] ss:$12 sps:$4 sm:$0xff]   ;;  %v2810_v15 = vld [vmem:[#allocation3 + $0xa8] ss:$12 sps:$4 sm:$0xff]  }
  0x55   : > { %678 = vmatprep.subr.bf16.mxu0 %v2748_v59  ;;  %v2795_v10 = vld [vmem:[#allocation2 + $0x50] ss:$12 sps:$4 sm:$0xff]   ;;  %v2805_v13 = vld [vmem:[#allocation2 + $0x38] ss:$12 sps:$4 sm:$0xff]   ;;  %v2813_v16 = vld [vmem:[#allocation3 + $0x94] ss:$12 sps:$4 sm:$0xff]  }
  0x56   : > { %2057 = vmatpush3.bf16.msra.mxu1 %v2765_v1  ;;  %v2300_v14 = vld [vmem:[%s2584_s7] sm:$0xff]   ;;  %v2816_v17 = vld [vmem:[#allocation2 + $0x20] ss:$12 sps:$4 sm:$0xff]   ;;  %v2822_v19 = vld [vmem:[#allocation3 + $0x7c] ss:$12 sps:$4 sm:$0xff]   ;;  %v526_v50 = vshrl.u32 %v525_v47, 7 }
  0x57   : > { %2058 = vmatprep.subr.bf16.mxu1 %v3262_v55  ;;  %v2819_v18 = vld [vmem:[#allocation3 + $0x90] ss:$12 sps:$4 sm:$0xff]   ;;  %v2827_v20 = vld [vmem:[#allocation2 + $0x8] ss:$12 sps:$4 sm:$0xff]   ;;  %v2829_v21 = vld [vmem:[#allocation3 + $0x78] ss:$12 sps:$4 sm:$0xff]  }
  0x58   : > { %679 = vmatpush1.bf16.msra.mxu0 %v2751_v60  ;;  %v2832_v22 = vld [vmem:[#allocation3 + $0x64] ss:$12 sps:$4 sm:$0xff]   ;;  %v2841_v24 = vld [vmem:[#allocation3 + $0x60] ss:$12 sps:$4 sm:$0xff]   ;;  %v2853_v27 = vld [vmem:[#allocation3 + $0x48] ss:$12 sps:$4 sm:$0xff]  }
  0x59   : > { %680 = vmatprep.subr.bf16.mxu0 %v2754_v61  ;;  %v2835_v23 = vld [vmem:[#allocation3 + $0xb0] ss:$12 sps:$4 sm:$0xff]   ;;  %3294 = vst [vmem:[#allocation13_spill] sm:$0xff] %v2841_v24  ;;  %v2844_v25 = vld [vmem:[#allocation3 + $0x4c] ss:$12 sps:$4 sm:$0xff]   ;;  %3296 = vst [vmem:[#allocation15_spill] sm:$0xff] %v2853_v27 }
  0x5a   : > { %2059 = vmatpush3.bf16.msra.mxu1 %v2775_v4  ;;  %3295 = vst [vmem:[#allocation14_spill] sm:$0xff] %v2844_v25  ;;  %v2847_v26 = vld [vmem:[#allocation3 + $0x98] ss:$12 sps:$4 sm:$0xff]   ;;  %v2856_v28 = vld [vmem:[#allocation3 + $0x34] ss:$12 sps:$4 sm:$0xff]   ;;  %v2887_v38 = vld [vmem:[#allocation4 + $0x8] sm:$0xff] }
  0x5b   : > { %2060 = vmatprep.subr.bf16.mxu1 %v3262_v55  ;;  %3297 = vst [vmem:[#allocation16_spill] sm:$0xff] %v2856_v28  ;;  %v2859_v29 = vld [vmem:[#allocation3 + $0x80] ss:$12 sps:$4 sm:$0xff]   ;;  %v2863_v30 = vld [vmem:[#allocation3 + $0x30] ss:$12 sps:$4 sm:$0xff]   ;;  %v527_v52 = vsub.s32 0, %v526_v50 }
  0x5c   : > { %681 = vmatpush1.bf16.msra.mxu0 %v2759_v63  ;;  %3298 = vst [vmem:[#allocation17_spill] sm:$0xff] %v2863_v30  ;;  %v2866_v31 = vld [vmem:[#allocation3 + $0x1c] ss:$12 sps:$4 sm:$0xff]   ;;  %v2873_v33 = vld [vmem:[#allocation3 + $0x18] ss:$12 sps:$4 sm:$0xff]   ;;  %s1981_s27 = sshll.u32 (%p2564_p6), %s2464_s20, 4 }
  0x5d   : > { %682 = vmatprep.subr.bf16.mxu0 %v2761_v0  ;;  %3299 = vst [vmem:[#allocation18_spill] sm:$0xff] %v2866_v31  ;;  %v2869_v32 = vld [vmem:[#allocation3 + $0x68] ss:$12 sps:$4 sm:$0xff]   ;;  %3301 = vst [vmem:[#allocation20_spill] sm:$0xff] %v2873_v33  ;;  %v2876_v34 = vld [vmem:[#allocation3 + $0x4] ss:$12 sps:$4 sm:$0xff]  }
  0x5e   : > { %2061 = vmatpush3.bf16.msra.mxu1 %v2785_v7  ;;  %3300 = vst [vmem:[#allocation19_spill] sm:$0xff] %v2869_v32  ;;  %3302 = vst [vmem:[#allocation21_spill] sm:$0xff] %v2876_v34  ;;  %v2879_v35 = vld [vmem:[#allocation3 + $0x50] ss:$12 sps:$4 sm:$0xff]   ;;  %v2883_v36 = vld [vmem:[#allocation3] ss:$12 sps:$4 sm:$0xff]  }
  0x5f   : > { %2062 = vmatprep.subr.bf16.mxu1 %v3262_v55  ;;  %3303 = vst [vmem:[#allocation22_spill] sm:$0xff] %v2879_v35  ;;  %3304 = vst [vmem:[#allocation23_spill] sm:$0xff] %v2883_v36  ;;  %v2885_v37 = vld [vmem:[#allocation4] sm:$0xff]  ;;  %v2905_v42 = vld [vmem:[#allocation3 + $0x8] ss:$12 sps:$4 sm:$0xff]  }
  0x60   : > { %683 = vmatpush1.bf16.msra.mxu0 %v2768_v2  ;;  %v2891_v39 = vld [vmem:[#allocation3 + $0x38] ss:$12 sps:$4 sm:$0xff]   ;;  %v758_v40 = vpack.c.bf16 %v2887_v38, %v2885_v37  ;;  %v2898_v41 = vld [vmem:[#allocation3 + $0x20] ss:$12 sps:$4 sm:$0xff]   ;;  %3307 = vst [vmem:[#allocation26_spill] sm:$0xff] %v2905_v42 }
  0x61   : > { %684 = vmatprep.subr.bf16.mxu0 %v2771_v3  ;;  %3305 = vst [vmem:[#allocation24_spill] sm:$0xff] %v2891_v39  ;;  %3306 = vst [vmem:[#allocation25_spill] sm:$0xff] %v2898_v41  ;;  %v2339_v43 = vld [vmem:[%s2584_s7 + $0x8] sm:$0xff]  }
  0x62   : > { %2063 = vmatpush3.bf16.msra.mxu1 %v2795_v10 }
  0x63   : > { %2064 = vmatprep.subr.bf16.mxu1 %v3262_v55 }
  0x64   : > { %685 = vmatpush1.bf16.msra.mxu0 %v2779_v5 }
  0x65   : > { %686 = vmatprep.subr.bf16.mxu0 %v2781_v6 }
  0x66   : > { %2065 = vmatpush3.bf16.msra.mxu1 %v2805_v13 }
  0x67   : > { %2066 = vmatprep.subr.bf16.mxu1 %v3262_v55 }
  0x68   : > { %687 = vmatpush1.bf16.msra.mxu0 %v2788_v8 }
  0x69   : > { %688 = vmatprep.subr.bf16.mxu0 %v2791_v9 }
  0x6a   : > { %2067 = vmatpush3.bf16.msra.mxu1 %v2816_v17 }
  0x6b   : > { %2068 = vmatprep.subr.bf16.mxu1 %v3262_v55 }
  0x6c   : > { %689 = vmatpush1.bf16.msra.mxu0 %v2799_v11 }
  0x6d   : > { %887 = vmatprep.subr.bf16.mxu0 %v2802_v12 }
  0x6e   : > { %2069 = vmatpush3.bf16.msra.mxu1 %v2827_v20 }
  0x6f   : > { %707 = vmatmul.mubr.bf16.vlgmr.msra.gmra.mxu0 %v2300_v14  ;;  %2074 = vmatprep.subr.bf16.mxu1 %v3262_v55 }
  0x70   : > { %888 = vmatpush1.bf16.msra.mxu0 %v2810_v15  ;;  %919 = vmatprep.mubr.bf16.mxu0 %v3259_v56 }
  0x71   : > { %889 = vmatprep.subr.bf16.mxu0 %v2813_v16  ;;  %2071 = vmatmul.mubr.bf16.vlgmr.msra.gmra.mxu1 %v2300_v14  ;;  %v518_v14 = vld [vmem:[%s3256_s3] sm:$0x7] }
  0x72   : > { %2075 = vmatpush3.bf16.msra.mxu1 %v2835_v23  ;;  %2090 = vmatprep.mubr.msk.bf16.mxu1 %vm2485_vm0, %v3262_v55 }
  0x73   : > { %2076 = vmatprep.subr.bf16.mxu1 %v3262_v55 }
  0x74   : > { %890 = vmatpush1.bf16.msra.mxu0 %v2819_v18 }
  0x75   : > { %891 = vmatprep.subr.bf16.mxu0 %v2822_v19 }
  0x76   : > { %2077 = vmatpush3.bf16.msra.mxu1 %v2847_v26 }
  0x77   : > { %2078 = vmatprep.subr.bf16.mxu1 %v3262_v55 }
  0x78   : > { %892 = vmatpush1.bf16.msra.mxu0 %v2829_v21 }
  0x79   : > { %893 = vmatprep.subr.bf16.mxu0 %v2832_v22 }
  0x7a   : > { %2079 = vmatpush3.bf16.msra.mxu1 %v2859_v29 }
  0x7b   : > { %2080 = vmatprep.subr.bf16.mxu1 %v3262_v55 }
  0x7c   : > { %894 = vmatpush1.bf16.msra.mxu0 %v2841_v24 }
  0x7d   : > { %895 = vmatprep.subr.bf16.mxu0 %v2844_v25 }
  0x7e   : > { %2081 = vmatpush3.bf16.msra.mxu1 %v2869_v32 }
  0x7f   : > { %2082 = vmatprep.subr.bf16.mxu1 %v3262_v55 }
  0x80   : > { %896 = vmatpush1.bf16.msra.mxu0 %v2853_v27 }
  0x81   : > { %897 = vmatprep.subr.bf16.mxu0 %v2856_v28 }
  0x82   : > { %2083 = vmatpush3.bf16.msra.mxu1 %v2879_v35 }
  0x83   : > { %2084 = vmatprep.subr.bf16.mxu1 %v3262_v55 }
  0x84   : > { %898 = vmatpush1.bf16.msra.mxu0 %v2863_v30 }
  0x85   : > { %899 = vmatprep.subr.bf16.mxu0 %v2866_v31 }
  0x86   : > { %2085 = vmatpush3.bf16.msra.mxu1 %v2891_v39 }
  0x87   : > { %2086 = vmatprep.subr.bf16.mxu1 %v3262_v55 }
  0x88   : > { %900 = vmatpush1.bf16.msra.mxu0 %v2873_v33 }
  0x89   : > { %901 = vmatprep.subr.bf16.mxu0 %v2876_v34 }
  0x8a   : > { %2087 = vmatpush3.bf16.msra.mxu1 %v2898_v41 }
  0x8b   : > { %2088 = vmatprep.subr.bf16.mxu1 %v3262_v55 }
  0x8c   : > { %902 = vmatpush1.bf16.msra.mxu0 %v2883_v36 }
  0x8d   : > { %1032 = vmatprep.subr.bf16.mxu0 %v2733_v53 }
  0x8e   : > { %2089 = vmatpush3.bf16.msra.mxu1 %v2905_v42 }
  0x8f   : > { %920 = vmatmul.mubr.bf16.vlgmr.msra.gmra.mxu0 %v758_v40  ;;  %2094 = vmatprep.subr.bf16.mxu1 %v3262_v55 }
  0x90   : > { %1033 = vmatpush1.bf16.msra.mxu0 %v2735_v54  ;;  %1064 = vmatprep.mubr.bf16.mxu0 %v3259_v56 }
  0x91   : > { %1034 = vmatprep.subr.bf16.mxu0 %v2740_v57  ;;  %2091 = vmatmul.mubr.bf16.vlgmr.msra.gmra.mxu1 %v758_v40 }
  0x92   : > { %2095 = vmatpush3.bf16.msra.mxu1 %v2756_v62  ;;  %2110 = vmatprep.mubr.msk.bf16.mxu1 %vm2485_vm0, %v3262_v55 }
  0x93   : > { %2096 = vmatprep.subr.bf16.mxu1 %v3262_v55 }
  0x94   : > { %1035 = vmatpush1.bf16.msra.mxu0 %v2745_v58 }
  0x95   : > { %1036 = vmatprep.subr.bf16.mxu0 %v2748_v59 }
  0x96   : > { %2097 = vmatpush3.bf16.msra.mxu1 %v2765_v1 }
  0x97   : > { %2098 = vmatprep.subr.bf16.mxu1 %v3262_v55 }
  0x98   : > { %1037 = vmatpush1.bf16.msra.mxu0 %v2751_v60 }
  0x99   : > { %1038 = vmatprep.subr.bf16.mxu0 %v2754_v61 }
  0x9a   : > { %2099 = vmatpush3.bf16.msra.mxu1 %v2775_v4 }
  0x9b   : > { %2100 = vmatprep.subr.bf16.mxu1 %v3262_v55 }
  0x9c   : > { %1039 = vmatpush1.bf16.msra.mxu0 %v2759_v63 }
  0x9d   : > { %1040 = vmatprep.subr.bf16.mxu0 %v2761_v0 }
  0x9e   : > { %2101 = vmatpush3.bf16.msra.mxu1 %v2785_v7 }
  0x9f   : > { %2102 = vmatprep.subr.bf16.mxu1 %v3262_v55 }
  0xa0   : > { %1041 = vmatpush1.bf16.msra.mxu0 %v2768_v2 }
  0xa1   : > { %1042 = vmatprep.subr.bf16.mxu0 %v2771_v3 }
  0xa2   : > { %2103 = vmatpush3.bf16.msra.mxu1 %v2795_v10 }
  0xa3   : > { %2104 = vmatprep.subr.bf16.mxu1 %v3262_v55 }
  0xa4   : > { %1043 = vmatpush1.bf16.msra.mxu0 %v2779_v5 }
  0xa5   : > { %1044 = vmatprep.subr.bf16.mxu0 %v2781_v6 }
  0xa6   : > { %2105 = vmatpush3.bf16.msra.mxu1 %v2805_v13 }
  0xa7   : > { %2106 = vmatprep.subr.bf16.mxu1 %v3262_v55 }
  0xa8   : > { %1045 = vmatpush1.bf16.msra.mxu0 %v2788_v8 }
  0xa9   : > { %1046 = vmatprep.subr.bf16.mxu0 %v2791_v9 }
  0xaa   : > { %2107 = vmatpush3.bf16.msra.mxu1 %v2816_v17 }
  0xab   : > { %2108 = vmatprep.subr.bf16.mxu1 %v3262_v55 }
  0xac   : > { %1047 = vmatpush1.bf16.msra.mxu0 %v2799_v11 }
  0xad   : > { %1117 = vmatprep.subr.bf16.mxu0 %v2802_v12 }
  0xae   : > { %2109 = vmatpush3.bf16.msra.mxu1 %v2827_v20 }
  0xaf   : > { %2114 = vmatprep.subr.bf16.mxu1 %v3262_v55  ;;  %1065 = vmatmul.mubr.bf16.vlgmr.msra.gmra.mxu0 %v2339_v43 }
  0xb0   : > { %1118 = vmatpush1.bf16.msra.mxu0 %v2810_v15  ;;  %1149 = vmatprep.mubr.bf16.mxu0 %v3259_v56  ;;  %v531_v56 = vsub.s32 1, %v526_v50 }
  0xb1   : > { %2111 = vmatmul.mubr.bf16.vlgmr.msra.gmra.mxu1 %v2339_v43  ;;  %1119 = vmatprep.subr.bf16.mxu0 %v2813_v16  ;;  %v2982_v43 = vrot.slane %v518_v14, %v527_v52 }
  0xb2   : > { %2115 = vmatpush3.bf16.msra.mxu1 %v2835_v23  ;;  %2130 = vmatprep.mubr.msk.bf16.mxu1 %vm2485_vm0, %v3262_v55 }
  0xb3   : > { %2116 = vmatprep.subr.bf16.mxu1 %v3262_v55  ;;  %3308 = vst [vmem:[#allocation27_spill] sm:$0xff] %v2982_v43 }
  0xb4   : > { %1120 = vmatpush1.bf16.msra.mxu0 %v2819_v18 }
  0xb5   : > { %1121 = vmatprep.subr.bf16.mxu0 %v2822_v19 }
  0xb6   : > { %2117 = vmatpush3.bf16.msra.mxu1 %v2847_v26 }
  0xb7   : > { %2118 = vmatprep.subr.bf16.mxu1 %v3262_v55 }
  0xb8   : > { %1122 = vmatpush1.bf16.msra.mxu0 %v2829_v21 }
  0xb9   : > { %1123 = vmatprep.subr.bf16.mxu0 %v2832_v22 }
  0xba   : > { %2119 = vmatpush3.bf16.msra.mxu1 %v2859_v29 }
  0xbb   : > { %2120 = vmatprep.subr.bf16.mxu1 %v3262_v55 }
  0xbc   : > { %1124 = vmatpush1.bf16.msra.mxu0 %v2841_v24 }
  0xbd   : > { %1125 = vmatprep.subr.bf16.mxu0 %v2844_v25 }
  0xbe   : > { %2121 = vmatpush3.bf16.msra.mxu1 %v2869_v32 }
  0xbf   : > { %2122 = vmatprep.subr.bf16.mxu1 %v3262_v55 }
  0xc0   : > { %1126 = vmatpush1.bf16.msra.mxu0 %v2853_v27 }
  0xc1   : > { %1127 = vmatprep.subr.bf16.mxu0 %v2856_v28 }
  0xc2   : > { %2123 = vmatpush3.bf16.msra.mxu1 %v2879_v35 }
  0xc3   : > { %2124 = vmatprep.subr.bf16.mxu1 %v3262_v55 }
  0xc4   : > { %1128 = vmatpush1.bf16.msra.mxu0 %v2863_v30 }
  0xc5   : > { %1129 = vmatprep.subr.bf16.mxu0 %v2866_v31 }
  0xc6   : > { %2125 = vmatpush3.bf16.msra.mxu1 %v2891_v39 }
  0xc7   : > { %2126 = vmatprep.subr.bf16.mxu1 %v3262_v55 }
  0xc8   : > { %1130 = vmatpush1.bf16.msra.mxu0 %v2873_v33 }
  0xc9   : > { %1131 = vmatprep.subr.bf16.mxu0 %v2876_v34 }
  0xca   : > { %2127 = vmatpush3.bf16.msra.mxu1 %v2898_v41 }
  0xcb   : > { %2128 = vmatprep.subr.bf16.mxu1 %v3262_v55 }
  0xcc   : > { %1132 = vmatpush1.bf16.msra.mxu0 %v2883_v36 }
  0xcd   : > { %1257 = vmatprep.subr.bf16.mxu0 %v2733_v53 }
  0xce   : > { %2129 = vmatpush3.bf16.msra.mxu1 %v2905_v42 }
  0xcf   : > { %2134 = vmatprep.subr.bf16.mxu1 %v3262_v55 }
 0x12f   : > { %v708_v49 = vpop.f32.mrf.mxu0 }
 0x130   : > { %v709_v55 = vadd.f32 %v708_v49, %v2982_v43 }
 0x131   : > { %v751_v44 = vpop.f32.mrf.mxu1  ;;  %v710_v51 = vpop.f32.mrf.mxu0 }
 0x133   : > { %v2072_v45 = vpop.f32.mrf.mxu1  ;;  %v712_v40 = vpop.f32.mrf.mxu0 }
 0x134   : > { %v2985_v45 = vrot.slane %v518_v14, %v531_v56  ;;  %v713_v47 = vadd.f32 %v712_v40, %v2982_v43 }
 0x135   : > { %v754_v46 = vpop.f32.mrf.mxu1  ;;  %v714_v53 = vpop.f32.mrf.mxu0 }
 0x136   : > { %v711_v33 = vadd.f32 %v710_v51, %v2985_v45  ;;  %v715_v28 = vadd.f32 %v714_v53, %v2985_v45  ;;  %v2993_v53 = vld [vmem:[%s3257_s4] ss:$0 sm:$0xff] }
 0x137   : > { %v2073_v48 = vpop.f32.mrf.mxu1 }
 0x14f   : > { %v921_v42 = vpop.f32.mrf.mxu0 }
 0x150   : > { %v971_v36 = vadd.f32 %v921_v42, %v709_v55 }
 0x151   : > { %v923_v48 = vpop.f32.mrf.mxu0  ;;  %v964_v49 = vpop.f32.mrf.mxu1 }
 0x152   : > { %v1939_v34 = vmul.f32 -1.442695, %v971_v36  ;;  %v985_v39 = vadd.f32 %v923_v48, %v711_v33 }
 0x153   : > { %v925_v41 = vpop.f32.mrf.mxu0  ;;  %v2092_v27 = vpop.f32.mrf.mxu1 }
 0x154   : > { %2342 = vpow2.f32 %v1939_v34  ;;  %v972_v31 = vadd.f32 %v925_v41, %v713_v47  ;;  %v1941_v56 = vmul.f32 -1.442695, %v985_v39 }
 0x155   : > { %v927_v30 = vpop.f32.mrf.mxu0  ;;  %v967_v55 = vpop.f32.mrf.mxu1 }
 0x156   : > { %v1940_v52 = vmul.f32 -1.442695, %v972_v31  ;;  %v986_v35 = vadd.f32 %v927_v30, %v715_v28  ;;  %v535_v31 = vsub.s32 2, %v526_v50  ;;  %v1006_v50 = vadd.f32 %v2993_v53, %v967_v55 }
 0x157   : > { %v2093_v40 = vpop.f32.mrf.mxu1 }
 0x158   : > { %2344 = vpow2.f32 %v1940_v52  ;;  %v1942_v42 = vmul.f32 -1.442695, %v986_v35  ;;  %v2995_v27 = vrot.slane %v518_v14, %v535_v31  ;;  %v1005_v35 = vadd.f32 %v2993_v53, %v964_v49 }
 0x159   : > { %2346 = vpow2.f32 %v1941_v56 }
 0x15a   : > { %2348 = vpow2.f32 %v1942_v42  ;;  %v755_v56 = vadd.f32 %v754_v46, %v2995_v27 }
 0x161   : > { %v2343_v36 = vpop.eup %2342 }
 0x162   : > { %v979_v43 = vadd.f32 1.0, %v2343_v36 }
 0x164   : > { %2350 = vrcp.f32 %v979_v43  ;;  %v752_v43 = vadd.f32 %v751_v44, %v2995_v27 }
 0x165   : > { %v2345_v34 = vpop.eup %2344 }
 0x166   : > { %v980_v41 = vadd.f32 1.0, %v2345_v34  ;;  %v2347_v33 = vpop.eup %2346 }
 0x167   : > { %v2349_v28 = vpop.eup %2348  ;;  %v993_v30 = vadd.f32 1.0, %v2347_v33 }
 0x168   : > { %2352 = vrcp.f32 %v980_v41  ;;  %v994_v51 = vadd.f32 1.0, %v2349_v28 }
 0x169   : > { %2354 = vrcp.f32 %v993_v30 }
 0x16a   : > { %2356 = vrcp.f32 %v994_v51 }
 0x171   : > { %v2351_v39 = vpop.eup %2350 }
 0x172   : > { %v1007_v48 = vmul.f32 %v2351_v39, %v1005_v35  ;;  %v3044_v39 = vpop.f32.mrf.mxu1 }
 0x174   : > { %v1009_v47 = vadd.f32 %v1007_v48, %v752_v43  ;;  %v2112_v51 = vpop.f32.mrf.mxu1 }
 0x175   : > { %v2353_v52 = vpop.eup %2352  ;;  %v3323_v51 = vld [vmem:[#allocation27_spill] sm:$0xff] }
 0x176   : > { %2358 = vtanh.f32 %v1009_v47  ;;  %v1008_v14 = vmul.f32 %v2353_v52, %v1006_v50  ;;  %v2355_v49 = vpop.eup %2354  ;;  %v3050_v43 = vpop.f32.mrf.mxu1  ;;  %v2340_v47 = vld [vmem:[%s2584_s7 + $0x10] sm:$0xff]   ;;  %v3311_v50 = vld [vmem:[#allocation15_spill] sm:$0xff] }
 0x177   : > { %v2357_v40 = vpop.eup %2356  ;;  %v1013_v36 = vsub.f32 1.0, %v2355_v49  ;;  %v1017_v41 = vmul.f32 %v2355_v49, %v2885_v37  ;;  %v3309_v37 = vmov 0.0   ;;  %v3312_v52 = vld [vmem:[#allocation22_spill] sm:$0xff] }
 0x178   : > { %v1010_v42 = vadd.f32 %v1008_v14, %v755_v56  ;;  %v1014_v31 = vsub.f32 1.0, %v2357_v40  ;;  %v1018_v46 = vmul.f32 %v2357_v40, %v2887_v38  ;;  %v3310_v38 = vmov 0   ;;  %v2113_v48 = vpop.f32.mrf.mxu1  ;;  %v3313_v56 = vld [vmem:[#allocation16_spill] sm:$0xff]  ;;  %v3314_v14 = vld [vmem:[#allocation17_spill] sm:$0xff]  ;;  %v3316_v49 = vld [vmem:[#allocation18_spill] sm:$0xff] }
 0x179   : > { %v3317_v40 = vld [vmem:[#allocation20_spill] sm:$0xff] }
 0x17a   : > { %2360 = vtanh.f32 %v1010_v42  ;;  %v3315_v42 = vld [vmem:[#allocation24_spill] sm:$0xff] }
 0x183   : > { %v2359_v34 = vpop.eup %2358 }
 0x184   : > { %v1015_v44 = vmul.f32 %v2359_v34, %v1013_v36  ;;  %v3318_v36 = vld [vmem:[#allocation25_spill] sm:$0xff] }
 0x185   : > { %v3319_v34 = vld [vmem:[#allocation21_spill] sm:$0xff] }
 0x186   : > { %v3002_v33 = vadd.f32 %v1017_v41, %v1015_v44  ;;  %v3320_v44 = vld [vmem:[#allocation23_spill] sm:$0xff]  ;;  %v3321_v41 = vld [vmem:[#allocation26_spill] sm:$0xff] }
 0x187   : > { %v2361_v55 = vpop.eup %2360 }
 0x188   : > { %v1016_v28 = vmul.f32 %v2361_v55, %v1014_v31  ;;  %1021 = vst [vmem:[%s2586_s9] sm:$0xff] %v3002_v33  ;;  %v3322_v31 = vld [vmem:[#allocation12_spill] sm:$0xff]  ;;  %v1066_v55 = vpop.f32.mrf.mxu0 }
 0x189   : > { %v1067_v48 = vadd.f32 %v1066_v55, %v3323_v51 }
 0x18a   : > { %v3007_v30 = vadd.f32 %v1018_v46, %v1016_v28  ;;  %v1068_v28 = vpop.f32.mrf.mxu0 }
 0x18c   : > { %1022 = vst [vmem:[%s2586_s9 + $0x8] sm:$0xff] %v3007_v30  ;;  %v1116_v35 = vpack.c.bf16 %v3007_v30, %v3002_v33  ;;  %v1070_v46 = vpop.f32.mrf.mxu0 }
 0x18e   : > { %1150 = vmatmul.mubr.bf16.vlgmr.msra.gmra.mxu0 %v1116_v35  ;;  %2131 = vmatmul.mubr.bf16.vlgmr.msra.gmra.mxu1 %v1116_v35  ;;  %v1072_v35 = vpop.f32.mrf.mxu0 }
 0x18f   : > { %1258 = vmatpush1.bf16.msra.mxu0 %v2735_v54  ;;  %2135 = vmatpush3.bf16.msra.mxu1 %v2756_v62  ;;  %v1073_v55 = vadd.f32 %v1072_v35, %v2985_v45  ;;  %v1113_v35 = vadd.f32 %v3050_v43, %v2995_v27 }
 0x190   : > { %1259 = vmatprep.subr.bf16.mxu0 %v2740_v57  ;;  %2136 = vmatprep.subr.bf16.mxu1 %v3309_v37 }
 0x191   : > { %1289 = vmatprep.mubr.bf16.mxu0 %v3310_v38  ;;  %2150 = vmatprep.mubr.msk.bf16.mxu1 %vm2485_vm0, %v3309_v37 }
 0x193   : > { %1260 = vmatpush1.bf16.msra.mxu0 %v2745_v58  ;;  %2137 = vmatpush3.bf16.msra.mxu1 %v2765_v1 }
 0x194   : > { %1261 = vmatprep.subr.bf16.mxu0 %v2748_v59  ;;  %2138 = vmatprep.subr.bf16.mxu1 %v3309_v37 }
 0x197   : > { %1262 = vmatpush1.bf16.msra.mxu0 %v2751_v60  ;;  %2139 = vmatpush3.bf16.msra.mxu1 %v2775_v4 }
 0x198   : > { %1263 = vmatprep.subr.bf16.mxu0 %v2754_v61  ;;  %2140 = vmatprep.subr.bf16.mxu1 %v3309_v37 }
 0x19b   : > { %1264 = vmatpush1.bf16.msra.mxu0 %v2759_v63  ;;  %2141 = vmatpush3.bf16.msra.mxu1 %v2785_v7 }
 0x19c   : > { %1265 = vmatprep.subr.bf16.mxu0 %v2761_v0  ;;  %2142 = vmatprep.subr.bf16.mxu1 %v3309_v37 }
 0x19f   : > { %1266 = vmatpush1.bf16.msra.mxu0 %v2768_v2  ;;  %2143 = vmatpush3.bf16.msra.mxu1 %v2795_v10 }
 0x1a0   : > { %1267 = vmatprep.subr.bf16.mxu0 %v2771_v3  ;;  %2144 = vmatprep.subr.bf16.mxu1 %v3309_v37 }
 0x1a3   : > { %1268 = vmatpush1.bf16.msra.mxu0 %v2779_v5  ;;  %2145 = vmatpush3.bf16.msra.mxu1 %v2805_v13 }
 0x1a4   : > { %1269 = vmatprep.subr.bf16.mxu0 %v2781_v6  ;;  %2146 = vmatprep.subr.bf16.mxu1 %v3309_v37 }
 0x1a7   : > { %1270 = vmatpush1.bf16.msra.mxu0 %v2788_v8  ;;  %2147 = vmatpush3.bf16.msra.mxu1 %v2816_v17 }
 0x1a8   : > { %1271 = vmatprep.subr.bf16.mxu0 %v2791_v9  ;;  %2148 = vmatprep.subr.bf16.mxu1 %v3309_v37 }
 0x1ab   : > { %1272 = vmatpush1.bf16.msra.mxu0 %v2799_v11  ;;  %2149 = vmatpush3.bf16.msra.mxu1 %v2827_v20 }
 0x1ac   : > { %1342 = vmatprep.subr.bf16.mxu0 %v2802_v12  ;;  %2154 = vmatprep.subr.bf16.mxu1 %v3309_v37 }
 0x1ae   : > { %1290 = vmatmul.mubr.bf16.vlgmr.msra.gmra.mxu0 %v2340_v47  ;;  %2151 = vmatmul.mubr.bf16.vlgmr.msra.gmra.mxu1 %v2340_v47 }
 0x1af   : > { %1343 = vmatpush1.bf16.msra.mxu0 %v2810_v15  ;;  %2155 = vmatpush3.bf16.msra.mxu1 %v2835_v23 }
 0x1b0   : > { %1344 = vmatprep.subr.bf16.mxu0 %v2813_v16  ;;  %2156 = vmatprep.subr.bf16.mxu1 %v3309_v37 }
 0x1b1   : > { %1374 = vmatprep.mubr.bf16.mxu0 %v3310_v38  ;;  %2170 = vmatprep.mubr.msk.bf16.mxu1 %vm2485_vm0, %v3309_v37 }
 0x1b3   : > { %1345 = vmatpush1.bf16.msra.mxu0 %v2819_v18  ;;  %2157 = vmatpush3.bf16.msra.mxu1 %v2847_v26 }
 0x1b4   : > { %1346 = vmatprep.subr.bf16.mxu0 %v2822_v19  ;;  %2158 = vmatprep.subr.bf16.mxu1 %v3309_v37 }
 0x1b7   : > { %1347 = vmatpush1.bf16.msra.mxu0 %v2829_v21  ;;  %2159 = vmatpush3.bf16.msra.mxu1 %v2859_v29 }
 0x1b8   : > { %1348 = vmatprep.subr.bf16.mxu0 %v2832_v22  ;;  %2160 = vmatprep.subr.bf16.mxu1 %v3309_v37 }
 0x1bb   : > { %1349 = vmatpush1.bf16.msra.mxu0 %v2841_v24  ;;  %2161 = vmatpush3.bf16.msra.mxu1 %v2869_v32 }
 0x1bc   : > { %1350 = vmatprep.subr.bf16.mxu0 %v2844_v25  ;;  %2162 = vmatprep.subr.bf16.mxu1 %v3309_v37 }
 0x1bf   : > { %1351 = vmatpush1.bf16.msra.mxu0 %v3311_v50  ;;  %2163 = vmatpush3.bf16.msra.mxu1 %v3312_v52 }
 0x1c0   : > { %1352 = vmatprep.subr.bf16.mxu0 %v3313_v56  ;;  %2164 = vmatprep.subr.bf16.mxu1 %v3309_v37 }
 0x1c3   : > { %1353 = vmatpush1.bf16.msra.mxu0 %v3314_v14  ;;  %2165 = vmatpush3.bf16.msra.mxu1 %v3315_v42  ;;  %v1071_v42 = vadd.f32 %v1070_v46, %v3323_v51 }
 0x1c4   : > { %1354 = vmatprep.subr.bf16.mxu0 %v3316_v49  ;;  %2166 = vmatprep.subr.bf16.mxu1 %v3309_v37 }
 0x1c7   : > { %1355 = vmatpush1.bf16.msra.mxu0 %v3317_v40  ;;  %2167 = vmatpush3.bf16.msra.mxu1 %v3318_v36 }
 0x1c8   : > { %1356 = vmatprep.subr.bf16.mxu0 %v3319_v34  ;;  %2168 = vmatprep.subr.bf16.mxu1 %v3309_v37 }
 0x1cb   : > { %1357 = vmatpush1.bf16.msra.mxu0 %v3320_v44  ;;  %2169 = vmatpush3.bf16.msra.mxu1 %v3321_v41 }
 0x1cc   : > { %1482 = vmatprep.subr.bf16.mxu0 %v3322_v31  ;;  %2174 = vmatprep.subr.bf16.mxu1 %v3309_v37  ;;  %v1069_v31 = vadd.f32 %v1068_v28, %v2985_v45 }
 0x24e   : > { %v1151_v47 = vpop.f32.mrf.mxu0  ;;  %v1194_v36 = vpop.f32.mrf.mxu1 }
 0x24f   : > { %v1201_v40 = vadd.f32 %v1151_v47, %v1067_v48 }
 0x250   : > { %v1153_v34 = vpop.f32.mrf.mxu0  ;;  %v2132_v49 = vpop.f32.mrf.mxu1 }
 0x251   : > { %v1947_v44 = vmul.f32 -1.442695, %v1201_v40  ;;  %v1215_v50 = vadd.f32 %v1153_v34, %v1069_v31 }
 0x252   : > { %v1155_v14 = vpop.f32.mrf.mxu0  ;;  %v1197_v41 = vpop.f32.mrf.mxu1 }
 0x253   : > { %2362 = vpow2.f32 %v1947_v44  ;;  %v1202_v56 = vadd.f32 %v1155_v14, %v1071_v42  ;;  %v1949_v48 = vmul.f32 -1.442695, %v1215_v50  ;;  %v1230_v50 = vadd.f32 %v2993_v53, %v1197_v41 }
 0x254   : > { %v2133_v52 = vpop.f32.mrf.mxu1  ;;  %v1157_v32 = vpop.f32.mrf.mxu0 }
 0x255   : > { %v1948_v25 = vmul.f32 -1.442695, %v1202_v56  ;;  %v1216_v24 = vadd.f32 %v1157_v32, %v1073_v55  ;;  %v1229_v56 = vadd.f32 %v2993_v53, %v1194_v36 }
 0x257   : > { %2364 = vpow2.f32 %v1948_v25  ;;  %v1950_v47 = vmul.f32 -1.442695, %v1216_v24  ;;  %v1110_v25 = vadd.f32 %v3044_v39, %v2995_v27 }
 0x258   : > { %2366 = vpow2.f32 %v1949_v48 }
 0x259   : > { %2368 = vpow2.f32 %v1950_v47 }
 0x260   : > { %v2363_v49 = vpop.eup %2362 }
 0x261   : > { %v1209_v40 = vadd.f32 1.0, %v2363_v49 }
 0x263   : > { %2370 = vrcp.f32 %v1209_v40 }
 0x264   : > { %v2365_v46 = vpop.eup %2364 }
 0x265   : > { %v1210_v51 = vadd.f32 1.0, %v2365_v46  ;;  %v2367_v44 = vpop.eup %2366 }
 0x266   : > { %v2369_v14 = vpop.eup %2368  ;;  %v1223_v52 = vadd.f32 1.0, %v2367_v44 }
 0x267   : > { %2372 = vrcp.f32 %v1210_v51  ;;  %v1224_v34 = vadd.f32 1.0, %v2369_v14 }
 0x268   : > { %2374 = vrcp.f32 %v1223_v52 }
 0x269   : > { %2376 = vrcp.f32 %v1224_v34 }
 0x270   : > { %v2371_v42 = vpop.eup %2370 }
 0x271   : > { %v1231_v32 = vmul.f32 %v2371_v42, %v1229_v56 }
 0x273   : > { %v1233_v24 = vadd.f32 %v1231_v32, %v1110_v25 }
 0x274   : > { %v2373_v28 = vpop.eup %2372 }
 0x275   : > { %2378 = vtanh.f32 %v1233_v24  ;;  %v1232_v51 = vmul.f32 %v2373_v28, %v1230_v50  ;;  %v2375_v31 = vpop.eup %2374 }
 0x276   : > { %v2377_v55 = vpop.eup %2376  ;;  %v1237_v48 = vsub.f32 1.0, %v2375_v31  ;;  %v1241_v49 = vmul.f32 %v2375_v31, %v3002_v33 }
 0x277   : > { %v1234_v36 = vadd.f32 %v1232_v51, %v1113_v35  ;;  %v1238_v40 = vsub.f32 1.0, %v2377_v55  ;;  %v1242_v43 = vmul.f32 %v2377_v55, %v3007_v30 }
 0x279   : > { %2380 = vtanh.f32 %v1234_v36 }
 0x282   : > { %v2379_v39 = vpop.eup %2378 }
 0x283   : > { %v1239_v47 = vmul.f32 %v2379_v39, %v1237_v48 }
 0x285   : > { %v3099_v41 = vadd.f32 %v1241_v49, %v1239_v47 }
 0x286   : > { %v2381_v46 = vpop.eup %2380 }
 0x287   : > { %v1240_v44 = vmul.f32 %v2381_v46, %v1238_v40  ;;  %1951 = vst [vmem:[%s2586_s9 + $0x10] sm:$0xff] %v3099_v41 }
 0x289   : > { %v3104_v14 = vadd.f32 %v1242_v43, %v1240_v44 }
 0x28b   : > { %1952 = vst [vmem:[%s2586_s9 + $0x18] sm:$0xff] %v3104_v14  ;;  %v1341_v52 = vpack.c.bf16 %v3104_v14, %v3099_v41 }
 0x28d   : > { %1375 = vmatmul.mubr.bf16.vlgmr.msra.gmra.mxu0 %v1341_v52  ;;  %2171 = vmatmul.mubr.bf16.vlgmr.msra.gmra.mxu1 %v1341_v52 }
 0x28e   : > { %1483 = vmatpush1.bf16.msra.mxu0 %v2735_v54  ;;  %2175 = vmatpush3.bf16.msra.mxu1 %v2756_v62  ;;  %v3141_v54 = vpop.f32.mrf.mxu1  ;;  %v3325_v62 = vld [vmem:[#allocation19_spill] sm:$0xff] }
 0x28f   : > { %1484 = vmatprep.subr.bf16.mxu0 %v2740_v57  ;;  %2176 = vmatprep.subr.bf16.mxu1 %v3309_v37  ;;  %v1335_v40 = vadd.f32 %v3141_v54, %v2995_v27 }
 0x290   : > { %1514 = vmatprep.mubr.bf16.mxu0 %v3310_v38  ;;  %2190 = vmatprep.mubr.msk.bf16.mxu1 %vm2485_vm0, %v3309_v37  ;;  %v2152_v57 = vpop.f32.mrf.mxu1 }
 0x292   : > { %1485 = vmatpush1.bf16.msra.mxu0 %v2745_v58  ;;  %2177 = vmatpush3.bf16.msra.mxu1 %v2765_v1  ;;  %v3147_v58 = vpop.f32.mrf.mxu1  ;;  %v3328_v1 = vld [vmem:[#allocation22_spill] sm:$0xff] }
 0x293   : > { %1486 = vmatprep.subr.bf16.mxu0 %v2748_v59  ;;  %2178 = vmatprep.subr.bf16.mxu1 %v3309_v37  ;;  %v1338_v57 = vadd.f32 %v3147_v58, %v2995_v27 }
 0x294   : > { %v2153_v59 = vpop.f32.mrf.mxu1 }
 0x296   : > { %1487 = vmatpush1.bf16.msra.mxu0 %v2751_v60  ;;  %2179 = vmatpush3.bf16.msra.mxu1 %v2775_v4  ;;  %v2341_v60 = vld [vmem:[%s2584_s7 + $0x18] sm:$0xff]   ;;  %v3331_v4 = vld [vmem:[#allocation24_spill] sm:$0xff]  ;;  %s1973_s7 = sshll.u32 (%p2564_p6), %s2468_s21, 1 }
 0x297   : > { %1488 = vmatprep.subr.bf16.mxu0 %v2754_v61  ;;  %2180 = vmatprep.subr.bf16.mxu1 %v3309_v37  ;;  %v3324_v61 = vld [vmem:[#allocation13_spill] sm:$0xff]  ;;  %s1710_s28 = sadd.s32 (%p2564_p6), %s1981_s27, %s1973_s7 }
 0x298   : > { %s1975_s29 = sshll.u32 (%p2564_p6), %s1710_s28, 3 }
 0x299   : > { %s1712_s10 = scalar_lea.vmem (%p2564_p6), %s3258_s5, %s1975_s29 }
 0x29a   : > { %1489 = vmatpush1.bf16.msra.mxu0 %v2759_v63  ;;  %2181 = vmatpush3.bf16.msra.mxu1 %v2785_v7  ;;  %v3326_v63 = vld [vmem:[#allocation14_spill] sm:$0xff]  ;;  %v3334_v7 = vld [vmem:[#allocation25_spill] sm:$0xff] }
 0x29b   : > { %1490 = vmatprep.subr.bf16.mxu0 %v2761_v0  ;;  %2182 = vmatprep.subr.bf16.mxu1 %v3309_v37  ;;  %v3327_v0 = vld [vmem:[#allocation15_spill] sm:$0xff] }
 0x29e   : > { %1491 = vmatpush1.bf16.msra.mxu0 %v2768_v2  ;;  %2183 = vmatpush3.bf16.msra.mxu1 %v2795_v10  ;;  %v3329_v2 = vld [vmem:[#allocation16_spill] sm:$0xff]  ;;  %v3337_v10 = vld [vmem:[#allocation26_spill] sm:$0xff] }
 0x29f   : > { %1492 = vmatprep.subr.bf16.mxu0 %v2771_v3  ;;  %2184 = vmatprep.subr.bf16.mxu1 %v3309_v37  ;;  %v3330_v3 = vld [vmem:[#allocation17_spill] sm:$0xff] }
 0x2a2   : > { %1493 = vmatpush1.bf16.msra.mxu0 %v2779_v5  ;;  %2185 = vmatpush3.bf16.msra.mxu1 %v2805_v13  ;;  %v3332_v5 = vld [vmem:[#allocation18_spill] sm:$0xff] }
 0x2a3   : > { %1494 = vmatprep.subr.bf16.mxu0 %v2781_v6  ;;  %2186 = vmatprep.subr.bf16.mxu1 %v3309_v37  ;;  %v3333_v6 = vld [vmem:[#allocation20_spill] sm:$0xff] }
 0x2a6   : > { %1495 = vmatpush1.bf16.msra.mxu0 %v2788_v8  ;;  %2187 = vmatpush3.bf16.msra.mxu1 %v2816_v17  ;;  %v3335_v8 = vld [vmem:[#allocation21_spill] sm:$0xff] }
 0x2a7   : > { %1496 = vmatprep.subr.bf16.mxu0 %v2791_v9  ;;  %2188 = vmatprep.subr.bf16.mxu1 %v3309_v37  ;;  %v3336_v9 = vld [vmem:[#allocation23_spill] sm:$0xff] }
 0x2aa   : > { %1497 = vmatpush1.bf16.msra.mxu0 %v2799_v11  ;;  %2189 = vmatpush3.bf16.msra.mxu1 %v2827_v20  ;;  %v1291_v11 = vpop.f32.mrf.mxu0 }
 0x2ab   : > { %1567 = vmatprep.subr.bf16.mxu0 %v2802_v12  ;;  %2194 = vmatprep.subr.bf16.mxu1 %v3309_v37 }
 0x2ac   : > { %v1293_v12 = vpop.f32.mrf.mxu0 }
 0x2ad   : > { %1515 = vmatmul.mubr.bf16.vlgmr.msra.gmra.mxu0 %v2341_v60  ;;  %2191 = vmatmul.mubr.bf16.vlgmr.msra.gmra.mxu1 %v2341_v60  ;;  %v1294_v30 = vadd.f32 %v1293_v12, %v2985_v45 }
 0x2ae   : > { %1568 = vmatpush1.bf16.msra.mxu0 %v2810_v15  ;;  %2195 = vmatpush3.bf16.msra.mxu1 %v2835_v23  ;;  %v1295_v13 = vpop.f32.mrf.mxu0 }
 0x2af   : > { %1569 = vmatprep.subr.bf16.mxu0 %v2813_v16  ;;  %2196 = vmatprep.subr.bf16.mxu1 %v3309_v37  ;;  %v3338_v16 = vld [vmem:[#allocation27_spill] sm:$0xff] }
 0x2b0   : > { %1599 = vmatprep.mubr.bf16.mxu0 %v3310_v38  ;;  %2210 = vmatprep.mubr.msk.bf16.mxu1 %vm2485_vm0, %v3309_v37  ;;  %v1297_v15 = vpop.f32.mrf.mxu0  ;;  %v1292_v17 = vadd.f32 %v1291_v11, %v3338_v16  ;;  %v1296_v23 = vadd.f32 %v1295_v13, %v3338_v16 }
 0x2b1   : > { %v1298_v25 = vadd.f32 %v1297_v15, %v2985_v45 }
 0x2b2   : > { %1570 = vmatpush1.bf16.msra.mxu0 %v2819_v18  ;;  %2197 = vmatpush3.bf16.msra.mxu1 %v2847_v26 }
 0x2b3   : > { %1571 = vmatprep.subr.bf16.mxu0 %v2822_v19  ;;  %2198 = vmatprep.subr.bf16.mxu1 %v3309_v37 }
 0x2b6   : > { %1572 = vmatpush1.bf16.msra.mxu0 %v2829_v21  ;;  %2199 = vmatpush3.bf16.msra.mxu1 %v2859_v29 }
 0x2b7   : > { %1573 = vmatprep.subr.bf16.mxu0 %v2832_v22  ;;  %2200 = vmatprep.subr.bf16.mxu1 %v3309_v37 }
 0x2ba   : > { %1574 = vmatpush1.bf16.msra.mxu0 %v3324_v61  ;;  %2201 = vmatpush3.bf16.msra.mxu1 %v3325_v62 }
 0x2bb   : > { %1575 = vmatprep.subr.bf16.mxu0 %v3326_v63  ;;  %2202 = vmatprep.subr.bf16.mxu1 %v3309_v37 }
 0x2be   : > { %1576 = vmatpush1.bf16.msra.mxu0 %v3327_v0  ;;  %2203 = vmatpush3.bf16.msra.mxu1 %v3328_v1 }
 0x2bf   : > { %1577 = vmatprep.subr.bf16.mxu0 %v3329_v2  ;;  %2204 = vmatprep.subr.bf16.mxu1 %v3309_v37 }
 0x2c2   : > { %1578 = vmatpush1.bf16.msra.mxu0 %v3330_v3  ;;  %2205 = vmatpush3.bf16.msra.mxu1 %v3331_v4 }
 0x2c3   : > { %1579 = vmatprep.subr.bf16.mxu0 %v3332_v5  ;;  %2206 = vmatprep.subr.bf16.mxu1 %v3309_v37 }
 0x2c6   : > { %1580 = vmatpush1.bf16.msra.mxu0 %v3333_v6  ;;  %2207 = vmatpush3.bf16.msra.mxu1 %v3334_v7 }
 0x2c7   : > { %1581 = vmatprep.subr.bf16.mxu0 %v3335_v8  ;;  %2208 = vmatprep.subr.bf16.mxu1 %v3309_v37 }
 0x2ca   : > { %1582 = vmatpush1.bf16.msra.mxu0 %v3336_v9  ;;  %2209 = vmatpush3.bf16.msra.mxu1 %v3337_v10 }
 0x34d   : > { %v1376_v18 = vpop.f32.mrf.mxu0  ;;  %v1419_v19 = vpop.f32.mrf.mxu1 }
 0x34e   : > { %v1426_v20 = vadd.f32 %v1376_v18, %v1292_v17  ;;  %v1454_v39 = vadd.f32 %v2993_v53, %v1419_v19 }
 0x34f   : > { %v1378_v21 = vpop.f32.mrf.mxu0  ;;  %v2172_v22 = vpop.f32.mrf.mxu1 }
 0x350   : > { %v1956_v26 = vmul.f32 -1.442695, %v1426_v20  ;;  %v1440_v56 = vadd.f32 %v1378_v21, %v1294_v30 }
 0x351   : > { %v1380_v29 = vpop.f32.mrf.mxu0  ;;  %v1422_v33 = vpop.f32.mrf.mxu1 }
 0x352   : > { %2382 = vpow2.f32 %v1956_v26  ;;  %v1427_v37 = vadd.f32 %v1380_v29, %v1296_v23  ;;  %v1958_v24 = vmul.f32 -1.442695, %v1440_v56  ;;  %v1455_v43 = vadd.f32 %v2993_v53, %v1422_v33 }
 0x353   : > { %v2173_v38 = vpop.f32.mrf.mxu1  ;;  %v1382_v34 = vpop.f32.mrf.mxu0 }
 0x354   : > { %v1957_v42 = vmul.f32 -1.442695, %v1427_v37  ;;  %v1441_v32 = vadd.f32 %v1382_v34, %v1298_v25 }
 0x356   : > { %2384 = vpow2.f32 %v1957_v42  ;;  %v1959_v50 = vmul.f32 -1.442695, %v1441_v32 }
 0x357   : > { %2386 = vpow2.f32 %v1958_v24 }
 0x358   : > { %2388 = vpow2.f32 %v1959_v50 }
 0x35f   : > { %v2383_v28 = vpop.eup %2382 }
 0x360   : > { %v1434_v35 = vadd.f32 1.0, %v2383_v28 }
 0x362   : > { %2390 = vrcp.f32 %v1434_v35 }
 0x363   : > { %v2385_v51 = vpop.eup %2384 }
 0x364   : > { %v1435_v36 = vadd.f32 1.0, %v2385_v51  ;;  %v2387_v31 = vpop.eup %2386 }
 0x365   : > { %v2389_v55 = vpop.eup %2388  ;;  %v1448_v48 = vadd.f32 1.0, %v2387_v31 }
 0x366   : > { %2392 = vrcp.f32 %v1435_v36  ;;  %v1449_v49 = vadd.f32 1.0, %v2389_v55 }
 0x367   : > { %2394 = vrcp.f32 %v1448_v48 }
 0x368   : > { %2396 = vrcp.f32 %v1449_v49 }
 0x36d   : > { %v1559_v8 = vpop.f32.mrf.mxu1  ;;  %v1516_v11 = vpop.f32.mrf.mxu0 }
 0x36f   : > { %v2391_v47 = vpop.eup %2390  ;;  %v1518_v12 = vpop.f32.mrf.mxu0 }
 0x370   : > { %v1456_v46 = vmul.f32 %v2391_v47, %v1454_v39  ;;  %v1519_v33 = vadd.f32 %v1518_v12, %v2985_v45 }
 0x371   : > { %v1520_v13 = vpop.f32.mrf.mxu0 }
 0x372   : > { %v1458_v44 = vadd.f32 %v1456_v46, %v1335_v40  ;;  %v1521_v22 = vadd.f32 %v1520_v13, %v3338_v16 }
 0x373   : > { %v2393_v52 = vpop.eup %2392  ;;  %v1522_v15 = vpop.f32.mrf.mxu0 }
 0x374   : > { %2398 = vtanh.f32 %v1458_v44  ;;  %v1457_v59 = vmul.f32 %v2393_v52, %v1455_v43  ;;  %v2395_v61 = vpop.eup %2394  ;;  %v1523_v34 = vadd.f32 %v1522_v15, %v2985_v45  ;;  %v1560_v45 = vadd.f32 %v1559_v8, %v2995_v27 }
 0x375   : > { %v2397_v62 = vpop.eup %2396  ;;  %v1462_v63 = vsub.f32 1.0, %v2395_v61  ;;  %v1466_v1 = vmul.f32 %v2395_v61, %v3099_v41  ;;  %v2192_v41 = vpop.f32.mrf.mxu1 }
 0x376   : > { %v1459_v60 = vadd.f32 %v1457_v59, %v1338_v57  ;;  %v1463_v2 = vsub.f32 1.0, %v2397_v62  ;;  %v1467_v58 = vmul.f32 %v2397_v62, %v3104_v14  ;;  %v1517_v14 = vadd.f32 %v1516_v11, %v3338_v16 }
 0x377   : > { %v1562_v9 = vpop.f32.mrf.mxu1 }
 0x378   : > { %2400 = vtanh.f32 %v1459_v60  ;;  %v1563_v44 = vadd.f32 %v1562_v9, %v2995_v27 }
 0x379   : > { %v2193_v10 = vpop.f32.mrf.mxu1 }
 0x381   : > { %v2399_v54 = vpop.eup %2398 }
 0x382   : > { %v1464_v0 = vmul.f32 %v2399_v54, %v1462_v63 }
 0x384   : > { %v3194_v3 = vadd.f32 %v1466_v1, %v1464_v0 }
 0x385   : > { %v2401_v4 = vpop.eup %2400 }
 0x386   : > { %v1465_v5 = vmul.f32 %v2401_v4, %v1463_v2  ;;  %1960 = vst [vmem:[%s2586_s9 + $0x20] sm:$0xff] %v3194_v3  ;;  %v1757_v4 = vld [vmem:[%s2586_s9 + $0x8] sm:$0xff] (%p2564_p6) }
 0x387   : > { %1758 = vst [vmem:[%s1712_s10 + $0x8] sm:$0xff] (%p2564_p6), %v1757_v4 }
 0x388   : > { %v3199_v6 = vadd.f32 %v1467_v58, %v1465_v5  ;;  %v1759_v5 = vld [vmem:[%s2586_s9 + $0x10] sm:$0xff] (%p2564_p6)  ;;  %v1761_v58 = vld [vmem:[%s2586_s9 + $0x18] sm:$0xff] (%p2564_p6) }
 0x389   : > { %1760 = vst [vmem:[%s1712_s10 + $0x20] sm:$0xff] (%p2564_p6), %v1759_v5  ;;  %1762 = vst [vmem:[%s1712_s10 + $0x28] sm:$0xff] (%p2564_p6), %v1761_v58 }
 0x38a   : > { %1961 = vst [vmem:[%s2586_s9 + $0x28] sm:$0xff] %v3199_v6  ;;  %v1566_v7 = vpack.c.bf16 %v3199_v6, %v3194_v3 }
 0x38c   : > { %1600 = vmatmul.mubr.bf16.vlgmr.msra.gmra.mxu0 %v1566_v7  ;;  %2211 = vmatmul.mubr.bf16.vlgmr.msra.gmra.mxu1 %v1566_v7 }
 0x391   : > { %v1765_v7 = vld [vmem:[%s2586_s9 + $0x28] sm:$0xff] (%p2564_p6) }
 0x392   : > { %1766 = vst [vmem:[%s1712_s10 + $0x48] sm:$0xff] (%p2564_p6), %v1765_v7 }
 0x44c   : > { %v1601_v17 = vpop.f32.mrf.mxu0  ;;  %v1644_v18 = vpop.f32.mrf.mxu1 }
 0x44d   : > { %v1651_v19 = vadd.f32 %v1601_v17, %v1517_v14  ;;  %v1679_v55 = vadd.f32 %v2993_v53, %v1644_v18 }
 0x44e   : > { %v1603_v20 = vpop.f32.mrf.mxu0  ;;  %v2212_v21 = vpop.f32.mrf.mxu1 }
 0x44f   : > { %v1965_v23 = vmul.f32 -1.442695, %v1651_v19  ;;  %v1665_v38 = vadd.f32 %v1603_v20, %v1519_v33 }
 0x450   : > { %v1605_v26 = vpop.f32.mrf.mxu0  ;;  %v1647_v29 = vpop.f32.mrf.mxu1 }
 0x451   : > { %2402 = vpow2.f32 %v1965_v23  ;;  %v1652_v30 = vadd.f32 %v1605_v26, %v1521_v22  ;;  %v1967_v32 = vmul.f32 -1.442695, %v1665_v38  ;;  %v1680_v40 = vadd.f32 %v2993_v53, %v1647_v29 }
 0x452   : > { %v2213_v37 = vpop.f32.mrf.mxu1  ;;  %v1607_v42 = vpop.f32.mrf.mxu0 }
 0x453   : > { %v1966_v56 = vmul.f32 -1.442695, %v1652_v30  ;;  %v1666_v25 = vadd.f32 %v1607_v42, %v1523_v34 }
 0x455   : > { %2404 = vpow2.f32 %v1966_v56  ;;  %v1968_v24 = vmul.f32 -1.442695, %v1666_v25 }
 0x456   : > { %2406 = vpow2.f32 %v1967_v32 }
 0x457   : > { %2408 = vpow2.f32 %v1968_v24 }
 0x45e   : > { %v2403_v50 = vpop.eup %2402 }
 0x45f   : > { %v1659_v16 = vadd.f32 1.0, %v2403_v50 }
 0x461   : > { %2410 = vrcp.f32 %v1659_v16 }
 0x462   : > { %v2405_v28 = vpop.eup %2404 }
 0x463   : > { %v1660_v35 = vadd.f32 1.0, %v2405_v28  ;;  %v2407_v51 = vpop.eup %2406 }
 0x464   : > { %v2409_v36 = vpop.eup %2408  ;;  %v1673_v31 = vadd.f32 1.0, %v2407_v51 }
 0x465   : > { %2412 = vrcp.f32 %v1660_v35  ;;  %v1674_v39 = vadd.f32 1.0, %v2409_v36 }
 0x466   : > { %2414 = vrcp.f32 %v1673_v31 }
 0x467   : > { %2416 = vrcp.f32 %v1674_v39 }
 0x46e   : > { %v2411_v48 = vpop.eup %2410 }
 0x46f   : > { %v1681_v47 = vmul.f32 %v2411_v48, %v1679_v55 }
 0x471   : > { %v1683_v49 = vadd.f32 %v1681_v47, %v1560_v45 }
 0x472   : > { %v2413_v46 = vpop.eup %2412 }
 0x473   : > { %2418 = vtanh.f32 %v1683_v49  ;;  %v1682_v43 = vmul.f32 %v2413_v46, %v1680_v40  ;;  %v2415_v57 = vpop.eup %2414 }
 0x474   : > { %v2417_v59 = vpop.eup %2416  ;;  %v1687_v60 = vsub.f32 1.0, %v2415_v57  ;;  %v1691_v63 = vmul.f32 %v2415_v57, %v3194_v3  ;;  %v1755_v3 = vld [vmem:[%s2586_s9] sm:$0xff] (%p2564_p6) }
 0x475   : > { %v1684_v52 = vadd.f32 %v1682_v43, %v1563_v44  ;;  %v1688_v0 = vsub.f32 1.0, %v2417_v59  ;;  %v1692_v27 = vmul.f32 %v2417_v59, %v3199_v6  ;;  %v1763_v6 = vld [vmem:[%s2586_s9 + $0x20] sm:$0xff] (%p2564_p6)  ;;  %1756 = vst [vmem:[%s1712_s10] sm:$0xff] (%p2564_p6), %v1755_v3 }
 0x476   : > { %1764 = vst [vmem:[%s1712_s10 + $0x40] sm:$0xff] (%p2564_p6), %v1763_v6 }
 0x477   : > { %2420 = vtanh.f32 %v1684_v52 }
 0x480   : > { %v2419_v61 = vpop.eup %2418 }
 0x481   : > { %v1689_v62 = vmul.f32 %v2419_v61, %v1687_v60 }
 0x483   : > { %v1693_v54 = vadd.f32 %v1691_v63, %v1689_v62 }
 0x484   : > { %v2421_v53 = vpop.eup %2420 }
 0x485   : > { %1969 = vst [vmem:[%s2586_s9 + $0x30] sm:$0xff] %v1693_v54  ;;  %1698 = vst [vmem:[#allocation4] sm:$0xff] %v1693_v54  ;;  %v1690_v1 = vmul.f32 %v2421_v53, %v1688_v0  ;;  %1706 = sbr.rel (!%p2564_p6) target bundleno = 1170 (0x492), region = 149 }
 0x487   : > { %v1694_v2 = vadd.f32 %v1692_v27, %v1690_v1 }
 0x489   : > { %1970 = vst [vmem:[%s2586_s9 + $0x38] sm:$0xff] %v1694_v2  ;;  %1699 = vst [vmem:[#allocation4 + $0x8] sm:$0xff] %v1694_v2 }
 0x48c   : > { %v1767_v8 = vld [vmem:[%s2586_s9 + $0x30] sm:$0xff] }
 0x48d   : > { %1768 = vst [vmem:[%s1712_s10 + $0x60] sm:$0xff] %v1767_v8 }
 0x490   : > { %v1769_v41 = vld [vmem:[%s2586_s9 + $0x38] sm:$0xff] }
 0x491   : > { %1770 = vst [vmem:[%s1712_s10 + $0x68] sm:$0xff] %v1769_v41 }
 0x492 PF: > { %s15_s24 = sadd.s32 1, %s2480_s24   ;;  %s3339_s18 = smov %s2460_s19 }
 0x493   : > { %p12_p13 = scmp.ge.s32.totalorder %s15_s24, 8   ;;  %s3340_s19 = smov %s2572_s8 }
 0x494   : > { %s3341_s20 = smov %s2472_s22  ;;  %s3342_s21 = smov %s2476_s23 }
 0x495   : > { %s3343_s22 = smov %s3346_s25  ;;  %s3344_s23 = smov %s3350_s26 }
 0x496   :  { %14 = sbr.rel (!%p12_p13) target bundleno = 4 (0x4), region = 242 }
 0x49b   :  { %1786 = vsyncmov [#allocation5] }
 0x49e   :  { %s1787_s9 = vpop.sfrf %1786 }
 0x49f   :  { %p1978_p0 = scmp.ne.s32.totalorder %s1787_s9, 0 }
 0x4a1   :  { %1791 = shalt.err (%p1978_p0)  }
 0x4a2   :  { %1793 = vsyncmov [#allocation5 + $0x1] }
 0x4a5   :  { %s1794_s11 = vpop.sfrf %1793 }
 0x4a6   :  { %p1979_p1 = scmp.ne.s32.totalorder %s1794_s11, 0 }
 0x4a8   :  { %1798 = shalt.err (%p1979_p1)  }

</bundles_post_ra>
